<compile_context>
chip_gen: v5e
topology: v5e:2x2
jax: 0.10.0
libtpu: 0.0.40
codegen_flags: <defaults>
</compile_context>

<pallas_src>
import functools

import jax
import jax.numpy as jnp
from jax import lax
from jax.experimental import pallas as pl
from jax.experimental.pallas import tpu as pltpu


# ----------------------------------------------------------------------------
# Pallas kernel: one (direction, time-chunk) grid step of a residual BiLSTM.
# ----------------------------------------------------------------------------
def _bilstm_kernel(xf_ref, xr_ref, wih_ref, whh_ref, b_ref, out_ref,
                   xg_sc, h_sc, c_sc, *, seq_len, padded):
    # xf_ref : [2, tc*B, H] bf16  both feature halves of this time chunk
    # xr_ref : [tc, B, H]   bf16  this direction's residual half of the chunk
    # wih_ref: [2, H, 4H]   bf16  input-projection weights (one block per half)
    # whh_ref: [H, 4H]      bf16  recurrent weights, this direction
    # b_ref  : [1, 4H]      f32   b_ih + b_hh, this direction
    # out_ref: [tc, B, H]   bf16  this direction's output half (h + residual)
    # xg_sc  : [tc*B, 4H]   f32   per-chunk input-projection scratch
    # h_sc, c_sc: [B, H]    f32   recurrent state, persists across time chunks
    d = pl.program_id(0)               # 0 = forward, 1 = backward
    t = pl.program_id(1)               # time-chunk counter (per direction)
    n_chunks = pl.num_programs(1)
    tc, B, H = out_ref.shape

    @pl.when(t == 0)
    def _():
        h_sc[...] = jnp.zeros_like(h_sc)
        c_sc[...] = jnp.zeros_like(c_sc)

    # Fused input projection for the whole chunk (replaces the old hoisted f32
    # xg HBM round-trip): bf16 MXU inputs, f32 accumulation, bias folded once.
    xg_sc[...] = (
        jnp.dot(xf_ref[0], wih_ref[0], preferred_element_type=jnp.float32)
        + jnp.dot(xf_ref[1], wih_ref[1], preferred_element_type=jnp.float32)
        + b_ref[...])

    whh = whh_ref[...]                               # [H, 4H] bf16
    tb = t + d * (n_chunks - 1 - 2 * t)              # global time-chunk index

    def step(s, carry):
        h, c = carry
        # forward walks 0..tc-1 inside the chunk, backward walks tc-1..0
        idx = s + d * (tc - 1 - 2 * s)
        gates = xg_sc[pl.ds(idx * B, B), :] + jnp.dot(
            h.astype(jnp.bfloat16), whh, preferred_element_type=jnp.float32)
        i = jax.nn.sigmoid(gates[:, 0 * H:1 * H])
        f = jax.nn.sigmoid(gates[:, 1 * H:2 * H])
        g = jnp.tanh(gates[:, 2 * H:3 * H])
        o = jax.nn.sigmoid(gates[:, 3 * H:4 * H])
        c_new = f * c + i * g
        h_new = o * jnp.tanh(c_new)
        if padded:
            # Skip state updates on zero-padded tail timesteps so the backward
            # direction (which sees the padding first) keeps zero state.
            m = ((tb * tc + idx) < seq_len).astype(jnp.float32)
            c_new = m * c_new + (1.0 - m) * c
            h_new = m * h_new + (1.0 - m) * h
        # Residual fused into the writeback: output half d += input half d.
        out_ref[idx] = (h_new
                        + xr_ref[idx].astype(jnp.float32)).astype(out_ref.dtype)
        return (h_new, c_new)

    # h/c live in vregs across the unrolled chunk loop; VMEM only at the edges.
    h_fin, c_fin = lax.fori_loop(0, tc, step, (h_sc[...], c_sc[...]),
                                 unroll=True)
    h_sc[...] = h_fin
    c_sc[...] = c_fin


# ----------------------------------------------------------------------------
# One residual bidirectional LSTM layer in the chunked split layout.
#   xs: [n_chunks, 2, tc, B, H] bf16  ->  same shape/dtype.
# ----------------------------------------------------------------------------
def _bilstm_layer(xs, params, *, seq_len):
    n_chunks, _, tc, B, H = xs.shape
    padded = (n_chunks * tc != seq_len)

    wih = params["wih"].astype(jnp.bfloat16)     # [2 dir, 2 half, H, 4H]
    whh = params["whh"].astype(jnp.bfloat16)     # [2, H, 4H]
    b = params["b"]                              # [2, 1, 4H] f32

    # Flat view (free XLA reshape) used for the chunk projection GEMM.
    xs_flat = xs.reshape(n_chunks, 2, tc * B, H)

    # Time reversal for the backward direction is pure DMA addressing:
    # forward reads/writes chunk t, backward reads/writes chunk n_chunks-1-t.
    tb = lambda d, t: t + d * (n_chunks - 1 - 2 * t)

    kernel = functools.partial(_bilstm_kernel, seq_len=seq_len, padded=padded)
    return pl.pallas_call(
        kernel,
        out_shape=jax.ShapeDtypeStruct((n_chunks, 2, tc, B, H), jnp.bfloat16),
        grid_spec=pltpu.PrefetchScalarGridSpec(
            num_scalar_prefetch=0,
            grid=(2, n_chunks),
            in_specs=[
                # Both feature halves of the chunk (the projection needs D=2H).
                pl.BlockSpec((None, 2, tc * B, H),
                             lambda d, t: (tb(d, t), 0, 0, 0)),
                # This direction's residual half of the same chunk.
                pl.BlockSpec((None, None, tc, B, H),
                             lambda d, t: (tb(d, t), d, 0, 0, 0)),
                # Weights / bias: constant block index along t, so they are not
                # re-DMA'd every time chunk.  (pl.Buffered(1) would also
                # single-buffer them -- a VMEM knob for very large H on v7x.)
                pl.BlockSpec((None, 2, H, 4 * H), lambda d, t: (d, 0, 0, 0)),
                pl.BlockSpec((None, H, 4 * H), lambda d, t: (d, 0, 0)),
                pl.BlockSpec((None, 1, 4 * H), lambda d, t: (d, 0, 0)),
            ],
            # concat(fwd, bwd) happens in the writeback: direction d -> half d.
            out_specs=pl.BlockSpec((None, None, tc, B, H),
                                   lambda d, t: (tb(d, t), d, 0, 0, 0)),
            scratch_shapes=[
                pltpu.VMEM((tc * B, 4 * H), jnp.float32),   # chunk projection
                pltpu.VMEM((B, H), jnp.float32),            # h_{t-1}
                pltpu.VMEM((B, H), jnp.float32),            # c_{t-1}
            ],
        ),
        compiler_params=pltpu.CompilerParams(
            # Direction axis is independent -> both TensorCores on v7x;
            # time axis carries the recurrence -> sequential.
            dimension_semantics=("parallel", "arbitrary"),
            # Explicit budget: fits v7x's 64 MiB VMEM with headroom and lifts
            # the 16/32 MiB default scoped limits on v5e/v6e.
            vmem_limit_bytes=48 * 1024 * 1024),
    )(xs_flat, xs, wih, whh, b)


# ----------------------------------------------------------------------------
# Encoder: [T, B, D] f32 -> [T, B, D] f32 through a stack of residual BiLSTMs.
# Layout conversion to/from the chunked split layout happens once per call.
# ----------------------------------------------------------------------------
def lstm_encoder(x, layer_params, time_chunk=16):
    T, B, D = x.shape
    H = D // 2
    tc = max(1, min(time_chunk, T))
    n_chunks = pl.cdiv(T, tc)
    t_pad = n_chunks * tc

    xs = x.astype(jnp.bfloat16)
    if t_pad != T:
        xs = jnp.pad(xs, ((0, t_pad - T), (0, 0), (0, 0)))
    # [t_pad, B, D] -> [n_chunks, 2, tc, B, H]
    xs = xs.reshape(n_chunks, tc, B, 2, H).transpose(0, 3, 1, 2, 4)

    for p in layer_params:
        xs = _bilstm_layer(xs, p, seq_len=T)

    # [n_chunks, 2, tc, B, H] -> [T, B, D]
    out = xs.transpose(0, 2, 3, 1, 4).reshape(t_pad, B, D)[:T]
    return out.astype(jnp.float32)


# ----------------------------------------------------------------------------
# Pure-JAX f32 reference (lax.scan), used only for the correctness check.
# ----------------------------------------------------------------------------
def _ref_lstm_dir(x, w_ih_t, w_hh_t, b):
    T, B, _ = x.shape
    H = w_hh_t.shape[0]

    def step(carry, x_t):
        h, c = carry
        gates = x_t @ w_ih_t + h @ w_hh_t + b
        i = jax.nn.sigmoid(gates[:, 0 * H:1 * H])
        f = jax.nn.sigmoid(gates[:, 1 * H:2 * H])
        g = jnp.tanh(gates[:, 2 * H:3 * H])
        o = jax.nn.sigmoid(gates[:, 3 * H:4 * H])
        c = f * c + i * g
        h = o * jnp.tanh(c)
        return (h, c), h

    init = (jnp.zeros((B, H), jnp.float32), jnp.zeros((B, H), jnp.float32))
    _, hs = lax.scan(step, init, x)
    return hs


def _ref_encoder(x, layer_params):
    T, B, D = x.shape
    for p in layer_params:
        identity = x
        wih = p["wih"].reshape(2, D, -1)         # [2, D, 4H]
        h_f = _ref_lstm_dir(x, wih[0], p["whh"][0], p["b"][0, 0])
        h_b = _ref_lstm_dir(x[::-1], wih[1], p["whh"][1], p["b"][1, 0])[::-1]
        x = jnp.concatenate([h_f, h_b], axis=-1) + identity
    return x


# ----------------------------------------------------------------------------
# Parameter init (deterministic, nn.LSTM shapes per direction: W_ih [4H, D],
# W_hh [4H, H], b_ih/b_hh [4H]); stored pre-transposed, input dim split in two
# halves for the split-feature layout.
# ----------------------------------------------------------------------------
def init_params(key, num_layers, dim):
    H = dim // 2
    scale = 1.0 / (H ** 0.5)
    params = []
    for _ in range(num_layers):
        wihs, whhs, bs = [], [], []
        for _dir in range(2):                    # 0 = forward, 1 = backward
            key, k1, k2, k3, k4 = jax.random.split(key, 5)
            w_ih = jax.random.uniform(k1, (4 * H, dim), jnp.float32, -scale, scale)
            w_hh = jax.random.uniform(k2, (4 * H, H), jnp.float32, -scale, scale)
            b_ih = jax.random.uniform(k3, (4 * H,), jnp.float32, -scale, scale)
            b_hh = jax.random.uniform(k4, (4 * H,), jnp.float32, -scale, scale)
            wihs.append(w_ih.T)                  # [D, 4H]
            whhs.append(w_hh.T)                  # [H, 4H]
            bs.append(b_ih + b_hh)               # [4H]
        params.append({
            "wih": jnp.stack(wihs).reshape(2, 2, H, 4 * H),  # [dir, half, H, 4H]
            "whh": jnp.stack(whhs),                          # [2, H, 4H]
            "b": jnp.stack(bs)[:, None, :],                  # [2, 1, 4H]
        })
    return params


if __name__ == "__main__":
    NUM_LAYERS = 2
    DIM = 32          # must be even; per-direction hidden H = 16
    T, B = 8, 2       # seq len, batch

    key = jax.random.PRNGKey(0)
    key, kx = jax.random.split(key)
    x = jax.random.normal(kx, (T, B, DIM), jnp.float32)
    params = init_params(key, NUM_LAYERS, DIM)

    ref = _ref_encoder(x, params)

    # Path 1: single time chunk (tc == T, no padding).
    fn = jax.jit(functools.partial(lstm_encoder, layer_params=params))
    out = jax.block_until_ready(fn(x))
    assert out.shape == (T, B, DIM)
    err = float(jnp.max(jnp.abs(out - ref)))
    # Tolerance covers bf16 MXU inputs + bf16 inter-layer activations
    # (f32 accumulation / state) vs the all-f32 reference.
    assert jnp.allclose(out, ref, rtol=5e-2, atol=5e-2), err

    # Path 2: multiple chunks with a padded tail (t_pad=9 > T=8), exercising
    # the in-kernel padding mask and cross-chunk state carry.
    fn2 = jax.jit(functools.partial(lstm_encoder, layer_params=params,
                                    time_chunk=3))
    out2 = jax.block_until_ready(fn2(x))
    err2 = float(jnp.max(jnp.abs(out2 - ref)))
    assert jnp.allclose(out2, ref, rtol=5e-2, atol=5e-2), err2

    print("KERNEL_OK")
</pallas_src>

<mosaic_0001>
module attributes {stable_mosaic.version = 11 : i64} {
  func.func @_bilstm_kernel(%arg0: i32, %arg1: i32, %arg2: memref<1x2x16x16xbf16, #tpu.memory_space<vmem>>, %arg3: memref<1x1x8x2x16xbf16, #tpu.memory_space<vmem>>, %arg4: memref<1x2x16x64xbf16, #tpu.memory_space<vmem>>, %arg5: memref<1x16x64xbf16, #tpu.memory_space<vmem>>, %arg6: memref<1x1x64xf32, #tpu.memory_space<vmem>>, %arg7: memref<1x1x8x2x16xbf16, #tpu.memory_space<vmem>>, %arg8: memref<16x64xf32, #tpu.memory_space<vmem>>, %arg9: memref<2x16xf32, #tpu.memory_space<vmem>>, %arg10: memref<2x16xf32, #tpu.memory_space<vmem>>) attributes {dimension_semantics = [#tpu.dimension_semantics<parallel>, #tpu.dimension_semantics<arbitrary>], iteration_bounds = array<i64: 2, 1>, scalar_prefetch = 0 : i64, scratch_operands = 3 : i64, tpu.core_type = #tpu.core_type<tc>, window_params = [{transform_indices = @transform_0, window_bounds = array<i64: 1, 2, 16, 16>}, {transform_indices = @transform_1, window_bounds = array<i64: 1, 1, 8, 2, 16>}, {transform_indices = @transform_2, window_bounds = array<i64: 1, 2, 16, 64>}, {transform_indices = @transform_3, window_bounds = array<i64: 1, 16, 64>}, {transform_indices = @transform_4, window_bounds = array<i64: 1, 1, 64>}, {transform_indices = @transform_5, window_bounds = array<i64: 1, 1, 8, 2, 16>}]} {
    %c0_i32 = arith.constant 0 : i32
    %0 = arith.cmpi eq, %arg1, %c0_i32 : i32
    %1 = arith.extui %0 : i1 to i32
    %c0_i32_0 = arith.constant 0 : i32
    %2 = arith.cmpi ne, %1, %c0_i32_0 : i32
    scf.if %2 {
      %cst_161 = arith.constant 0.000000e+00 : f32
      %385 = vector.broadcast %cst_161 : f32 to vector<2x16xf32>
      %c0_162 = arith.constant 0 : index
      %c0_163 = arith.constant 0 : index
      %386 = vector.load %arg9[%c0_162, %c0_163] : memref<2x16xf32, #tpu.memory_space<vmem>>, vector<2x16xf32>
      tpu.vector_store %arg9[%c0_162, %c0_163], %385 {strides = array<i32>} : memref<2x16xf32, #tpu.memory_space<vmem>>, vector<2x16xf32>,
      %cst_164 = arith.constant 0.000000e+00 : f32
      %387 = vector.broadcast %cst_164 : f32 to vector<2x16xf32>
      %c0_165 = arith.constant 0 : index
      %c0_166 = arith.constant 0 : index
      %388 = vector.load %arg10[%c0_165, %c0_166] : memref<2x16xf32, #tpu.memory_space<vmem>>, vector<2x16xf32>
      tpu.vector_store %arg10[%c0_165, %c0_166], %387 {strides = array<i32>} : memref<2x16xf32, #tpu.memory_space<vmem>>, vector<2x16xf32>,
    } else {
    }
    %c0 = arith.constant 0 : index
    %c0_1 = arith.constant 0 : index
    %c0_2 = arith.constant 0 : index
    %c0_3 = arith.constant 0 : index
    %3 = vector.load %arg2[%c0, %c0_1, %c0_2, %c0_3] : memref<1x2x16x16xbf16, #tpu.memory_space<vmem>>, vector<1x1x16x16xbf16>
    %4 = vector.shape_cast %3 : vector<1x1x16x16xbf16> to vector<16x16xbf16>
    %c0_4 = arith.constant 0 : index
    %c0_5 = arith.constant 0 : index
    %c0_6 = arith.constant 0 : index
    %c0_7 = arith.constant 0 : index
    %5 = vector.load %arg4[%c0_4, %c0_5, %c0_6, %c0_7] : memref<1x2x16x64xbf16, #tpu.memory_space<vmem>>, vector<1x1x16x64xbf16>
    %6 = vector.shape_cast %5 : vector<1x1x16x64xbf16> to vector<16x64xbf16>
    %cst = arith.constant dense<0.000000e+00> : vector<16x64xf32>
    %7 = tpu.matmul %4, %6, %cst {dimension_numbers = #tpu.dot_dimension_numbers<[1], [0], [0], [1], [0, 0, 1, 1], [], []>} : vector<16x16xbf16>, vector<16x64xbf16>, vector<16x64xf32> -> vector<16x64xf32>
    %c0_8 = arith.constant 0 : index
    %c1 = arith.constant 1 : index
    %c0_9 = arith.constant 0 : index
    %c0_10 = arith.constant 0 : index
    %8 = vector.load %arg2[%c0_8, %c1, %c0_9, %c0_10] : memref<1x2x16x16xbf16, #tpu.memory_space<vmem>>, vector<1x1x16x16xbf16>
    %9 = vector.shape_cast %8 : vector<1x1x16x16xbf16> to vector<16x16xbf16>
    %c0_11 = arith.constant 0 : index
    %c1_12 = arith.constant 1 : index
    %c0_13 = arith.constant 0 : index
    %c0_14 = arith.constant 0 : index
    %10 = vector.load %arg4[%c0_11, %c1_12, %c0_13, %c0_14] : memref<1x2x16x64xbf16, #tpu.memory_space<vmem>>, vector<1x1x16x64xbf16>
    %11 = vector.shape_cast %10 : vector<1x1x16x64xbf16> to vector<16x64xbf16>
    %cst_15 = arith.constant dense<0.000000e+00> : vector<16x64xf32>
    %12 = tpu.matmul %9, %11, %cst_15 {dimension_numbers = #tpu.dot_dimension_numbers<[1], [0], [0], [1], [0, 0, 1, 1], [], []>} : vector<16x16xbf16>, vector<16x64xbf16>, vector<16x64xf32> -> vector<16x64xf32>
    %13 = arith.addf %7, %12 : vector<16x64xf32>
    %c0_16 = arith.constant 0 : index
    %c0_17 = arith.constant 0 : index
    %c0_18 = arith.constant 0 : index
    %14 = vector.load %arg6[%c0_16, %c0_17, %c0_18] : memref<1x1x64xf32, #tpu.memory_space<vmem>>, vector<1x1x64xf32>
    %15 = vector.shape_cast %14 : vector<1x1x64xf32> to vector<1x64xf32>
    %16 = vector.broadcast %15 : vector<1x64xf32> to vector<16x64xf32>
    %17 = arith.addf %13, %16 : vector<16x64xf32>
    %c0_19 = arith.constant 0 : index
    %c0_20 = arith.constant 0 : index
    %18 = vector.load %arg8[%c0_19, %c0_20] : memref<16x64xf32, #tpu.memory_space<vmem>>, vector<16x64xf32>
    tpu.vector_store %arg8[%c0_19, %c0_20], %17 {strides = array<i32>} : memref<16x64xf32, #tpu.memory_space<vmem>>, vector<16x64xf32>,
    %c0_21 = arith.constant 0 : index
    %c0_22 = arith.constant 0 : index
    %c0_23 = arith.constant 0 : index
    %19 = vector.load %arg5[%c0_21, %c0_22, %c0_23] : memref<1x16x64xbf16, #tpu.memory_space<vmem>>, vector<1x16x64xbf16>
    %20 = vector.shape_cast %19 : vector<1x16x64xbf16> to vector<16x64xbf16>
    %c0_24 = arith.constant 0 : index
    %c0_25 = arith.constant 0 : index
    %21 = vector.load %arg9[%c0_24, %c0_25] : memref<2x16xf32, #tpu.memory_space<vmem>>, vector<2x16xf32>
    %c0_26 = arith.constant 0 : index
    %c0_27 = arith.constant 0 : index
    %22 = vector.load %arg10[%c0_26, %c0_27] : memref<2x16xf32, #tpu.memory_space<vmem>>, vector<2x16xf32>
    %c0_i32_28 = arith.constant 0 : i32
    %c2_i32 = arith.constant 2 : i32
    %23 = arith.muli %c2_i32, %c0_i32_28 : i32
    %c7_i32 = arith.constant 7 : i32
    %24 = arith.subi %c7_i32, %23 : i32
    %25 = arith.muli %arg0, %24 : i32
    %26 = arith.addi %c0_i32_28, %25 : i32
    %c2_i32_29 = arith.constant 2 : i32
    %27 = arith.muli %26, %c2_i32_29 : i32
    %28 = arith.index_cast %27 : i32 to index
    %c0_30 = arith.constant 0 : index
    %29 = vector.load %arg8[%28, %c0_30] : memref<16x64xf32, #tpu.memory_space<vmem>>, vector<2x64xf32>
    %30 = arith.truncf %21 : vector<2x16xf32> to vector<2x16xbf16>
    %cst_31 = arith.constant dense<0.000000e+00> : vector<2x64xf32>
    %31 = tpu.matmul %30, %20, %cst_31 {dimension_numbers = #tpu.dot_dimension_numbers<[1], [0], [0], [1], [0, 0, 1, 1], [], []>} : vector<2x16xbf16>, vector<16x64xbf16>, vector<2x64xf32> -> vector<2x64xf32>
    %32 = arith.addf %29, %31 : vector<2x64xf32>
    %33 = vector.extract_strided_slice %32 {offsets = [0, 0], sizes = [2, 16], strides = [1, 1]} : vector<2x64xf32> to vector<2x16xf32>
    %34 = arith.negf %33 : vector<2x16xf32>
    %35 = math.exp %34 : vector<2x16xf32>
    %cst_32 = arith.constant 1.000000e+00 : f32
    %36 = vector.broadcast %cst_32 : f32 to vector<2x16xf32>
    %37 = arith.addf %36, %35 : vector<2x16xf32>
    %38 = arith.divf %36, %37 : vector<2x16xf32>
    %39 = vector.extract_strided_slice %32 {offsets = [0, 16], sizes = [2, 16], strides = [1, 1]} : vector<2x64xf32> to vector<2x16xf32>
    %40 = arith.negf %39 : vector<2x16xf32>
    %41 = math.exp %40 : vector<2x16xf32>
    %cst_33 = arith.constant 1.000000e+00 : f32
    %42 = vector.broadcast %cst_33 : f32 to vector<2x16xf32>
    %43 = arith.addf %42, %41 : vector<2x16xf32>
    %44 = arith.divf %42, %43 : vector<2x16xf32>
    %45 = vector.extract_strided_slice %32 {offsets = [0, 32], sizes = [2, 16], strides = [1, 1]} : vector<2x64xf32> to vector<2x16xf32>
    %46 = math.tanh %45 : vector<2x16xf32>
    %47 = vector.extract_strided_slice %32 {offsets = [0, 48], sizes = [2, 16], strides = [1, 1]} : vector<2x64xf32> to vector<2x16xf32>
    %48 = arith.negf %47 : vector<2x16xf32>
    %49 = math.exp %48 : vector<2x16xf32>
    %cst_34 = arith.constant 1.000000e+00 : f32
    %50 = vector.broadcast %cst_34 : f32 to vector<2x16xf32>
    %51 = arith.addf %50, %49 : vector<2x16xf32>
    %52 = arith.divf %50, %51 : vector<2x16xf32>
    %53 = arith.mulf %44, %22 : vector<2x16xf32>
    %54 = arith.mulf %38, %46 : vector<2x16xf32>
    %55 = arith.addf %53, %54 : vector<2x16xf32>
    %56 = math.tanh %55 : vector<2x16xf32>
    %57 = arith.mulf %52, %56 : vector<2x16xf32>
    %c0_35 = arith.constant 0 : index
    %c0_36 = arith.constant 0 : index
    %58 = arith.index_cast %26 : i32 to index
    %c0_37 = arith.constant 0 : index
    %c0_38 = arith.constant 0 : index
    %59 = vector.load %arg3[%c0_35, %c0_36, %58, %c0_37, %c0_38] : memref<1x1x8x2x16xbf16, #tpu.memory_space<vmem>>, vector<1x1x1x2x16xbf16>
    %60 = vector.shape_cast %59 : vector<1x1x1x2x16xbf16> to vector<2x16xbf16>
    %61 = arith.extf %60 : vector<2x16xbf16> to vector<2x16xf32>
    %62 = arith.addf %57, %61 : vector<2x16xf32>
    %63 = arith.truncf %62 : vector<2x16xf32> to vector<2x16xbf16>
    %c0_39 = arith.constant 0 : index
    %c0_40 = arith.constant 0 : index
    %64 = arith.index_cast %26 : i32 to index
    %c0_41 = arith.constant 0 : index
    %c0_42 = arith.constant 0 : index
    %65 = vector.load %arg7[%c0_39, %c0_40, %64, %c0_41, %c0_42] : memref<1x1x8x2x16xbf16, #tpu.memory_space<vmem>>, vector<1x1x1x2x16xbf16>
    %66 = vector.shape_cast %65 : vector<1x1x1x2x16xbf16> to vector<2x16xbf16>
    %67 = vector.shape_cast %63 : vector<2x16xbf16> to vector<1x1x1x2x16xbf16>
    tpu.vector_store %arg7[%c0_39, %c0_40, %64, %c0_41, %c0_42], %67 {strides = array<i32>} : memref<1x1x8x2x16xbf16, #tpu.memory_space<vmem>>, vector<1x1x1x2x16xbf16>,
    %c1_i32 = arith.constant 1 : i32
    %c2_i32_43 = arith.constant 2 : i32
    %68 = arith.muli %c2_i32_43, %c1_i32 : i32
    %c7_i32_44 = arith.constant 7 : i32
    %69 = arith.subi %c7_i32_44, %68 : i32
    %70 = arith.muli %arg0, %69 : i32
    %71 = arith.addi %c1_i32, %70 : i32
    %c2_i32_45 = arith.constant 2 : i32
    %72 = arith.muli %71, %c2_i32_45 : i32
    %73 = arith.index_cast %72 : i32 to index
    %c0_46 = arith.constant 0 : index
    %74 = vector.load %arg8[%73, %c0_46] : memref<16x64xf32, #tpu.memory_space<vmem>>, vector<2x64xf32>
    %75 = arith.truncf %57 : vector<2x16xf32> to vector<2x16xbf16>
    %cst_47 = arith.constant dense<0.000000e+00> : vector<2x64xf32>
    %76 = tpu.matmul %75, %20, %cst_47 {dimension_numbers = #tpu.dot_dimension_numbers<[1], [0], [0], [1], [0, 0, 1, 1], [], []>} : vector<2x16xbf16>, vector<16x64xbf16>, vector<2x64xf32> -> vector<2x64xf32>
    %77 = arith.addf %74, %76 : vector<2x64xf32>
    %78 = vector.extract_strided_slice %77 {offsets = [0, 0], sizes = [2, 16], strides = [1, 1]} : vector<2x64xf32> to vector<2x16xf32>
    %79 = arith.negf %78 : vector<2x16xf32>
    %80 = math.exp %79 : vector<2x16xf32>
    %cst_48 = arith.constant 1.000000e+00 : f32
    %81 = vector.broadcast %cst_48 : f32 to vector<2x16xf32>
    %82 = arith.addf %81, %80 : vector<2x16xf32>
    %83 = arith.divf %81, %82 : vector<2x16xf32>
    %84 = vector.extract_strided_slice %77 {offsets = [0, 16], sizes = [2, 16], strides = [1, 1]} : vector<2x64xf32> to vector<2x16xf32>
    %85 = arith.negf %84 : vector<2x16xf32>
    %86 = math.exp %85 : vector<2x16xf32>
    %cst_49 = arith.constant 1.000000e+00 : f32
    %87 = vector.broadcast %cst_49 : f32 to vector<2x16xf32>
    %88 = arith.addf %87, %86 : vector<2x16xf32>
    %89 = arith.divf %87, %88 : vector<2x16xf32>
    %90 = vector.extract_strided_slice %77 {offsets = [0, 32], sizes = [2, 16], strides = [1, 1]} : vector<2x64xf32> to vector<2x16xf32>
    %91 = math.tanh %90 : vector<2x16xf32>
    %92 = vector.extract_strided_slice %77 {offsets = [0, 48], sizes = [2, 16], strides = [1, 1]} : vector<2x64xf32> to vector<2x16xf32>
    %93 = arith.negf %92 : vector<2x16xf32>
    %94 = math.exp %93 : vector<2x16xf32>
    %cst_50 = arith.constant 1.000000e+00 : f32
    %95 = vector.broadcast %cst_50 : f32 to vector<2x16xf32>
    %96 = arith.addf %95, %94 : vector<2x16xf32>
    %97 = arith.divf %95, %96 : vector<2x16xf32>
    %98 = arith.mulf %89, %55 : vector<2x16xf32>
    %99 = arith.mulf %83, %91 : vector<2x16xf32>
    %100 = arith.addf %98, %99 : vector<2x16xf32>
    %101 = math.tanh %100 : vector<2x16xf32>
    %102 = arith.mulf %97, %101 : vector<2x16xf32>
    %c0_51 = arith.constant 0 : index
    %c0_52 = arith.constant 0 : index
    %103 = arith.index_cast %71 : i32 to index
    %c0_53 = arith.constant 0 : index
    %c0_54 = arith.constant 0 : index
    %104 = vector.load %arg3[%c0_51, %c0_52, %103, %c0_53, %c0_54] : memref<1x1x8x2x16xbf16, #tpu.memory_space<vmem>>, vector<1x1x1x2x16xbf16>
    %105 = vector.shape_cast %104 : vector<1x1x1x2x16xbf16> to vector<2x16xbf16>
    %106 = arith.extf %105 : vector<2x16xbf16> to vector<2x16xf32>
    %107 = arith.addf %102, %106 : vector<2x16xf32>
    %108 = arith.truncf %107 : vector<2x16xf32> to vector<2x16xbf16>
    %c0_55 = arith.constant 0 : index
    %c0_56 = arith.constant 0 : index
    %109 = arith.index_cast %71 : i32 to index
    %c0_57 = arith.constant 0 : index
    %c0_58 = arith.constant 0 : index
    %110 = vector.load %arg7[%c0_55, %c0_56, %109, %c0_57, %c0_58] : memref<1x1x8x2x16xbf16, #tpu.memory_space<vmem>>, vector<1x1x1x2x16xbf16>
    %111 = vector.shape_cast %110 : vector<1x1x1x2x16xbf16> to vector<2x16xbf16>
    %112 = vector.shape_cast %108 : vector<2x16xbf16> to vector<1x1x1x2x16xbf16>
    tpu.vector_store %arg7[%c0_55, %c0_56, %109, %c0_57, %c0_58], %112 {strides = array<i32>} : memref<1x1x8x2x16xbf16, #tpu.memory_space<vmem>>, vector<1x1x1x2x16xbf16>,
    %c2_i32_59 = arith.constant 2 : i32
    %c2_i32_60 = arith.constant 2 : i32
    %113 = arith.muli %c2_i32_60, %c2_i32_59 : i32
    %c7_i32_61 = arith.constant 7 : i32
    %114 = arith.subi %c7_i32_61, %113 : i32
    %115 = arith.muli %arg0, %114 : i32
    %116 = arith.addi %c2_i32_59, %115 : i32
    %c2_i32_62 = arith.constant 2 : i32
    %117 = arith.muli %116, %c2_i32_62 : i32
    %118 = arith.index_cast %117 : i32 to index
    %c0_63 = arith.constant 0 : index
    %119 = vector.load %arg8[%118, %c0_63] : memref<16x64xf32, #tpu.memory_space<vmem>>, vector<2x64xf32>
    %120 = arith.truncf %102 : vector<2x16xf32> to vector<2x16xbf16>
    %cst_64 = arith.constant dense<0.000000e+00> : vector<2x64xf32>
    %121 = tpu.matmul %120, %20, %cst_64 {dimension_numbers = #tpu.dot_dimension_numbers<[1], [0], [0], [1], [0, 0, 1, 1], [], []>} : vector<2x16xbf16>, vector<16x64xbf16>, vector<2x64xf32> -> vector<2x64xf32>
    %122 = arith.addf %119, %121 : vector<2x64xf32>
    %123 = vector.extract_strided_slice %122 {offsets = [0, 0], sizes = [2, 16], strides = [1, 1]} : vector<2x64xf32> to vector<2x16xf32>
    %124 = arith.negf %123 : vector<2x16xf32>
    %125 = math.exp %124 : vector<2x16xf32>
    %cst_65 = arith.constant 1.000000e+00 : f32
    %126 = vector.broadcast %cst_65 : f32 to vector<2x16xf32>
    %127 = arith.addf %126, %125 : vector<2x16xf32>
    %128 = arith.divf %126, %127 : vector<2x16xf32>
    %129 = vector.extract_strided_slice %122 {offsets = [0, 16], sizes = [2, 16], strides = [1, 1]} : vector<2x64xf32> to vector<2x16xf32>
    %130 = arith.negf %129 : vector<2x16xf32>
    %131 = math.exp %130 : vector<2x16xf32>
    %cst_66 = arith.constant 1.000000e+00 : f32
    %132 = vector.broadcast %cst_66 : f32 to vector<2x16xf32>
    %133 = arith.addf %132, %131 : vector<2x16xf32>
    %134 = arith.divf %132, %133 : vector<2x16xf32>
    %135 = vector.extract_strided_slice %122 {offsets = [0, 32], sizes = [2, 16], strides = [1, 1]} : vector<2x64xf32> to vector<2x16xf32>
    %136 = math.tanh %135 : vector<2x16xf32>
    %137 = vector.extract_strided_slice %122 {offsets = [0, 48], sizes = [2, 16], strides = [1, 1]} : vector<2x64xf32> to vector<2x16xf32>
    %138 = arith.negf %137 : vector<2x16xf32>
    %139 = math.exp %138 : vector<2x16xf32>
    %cst_67 = arith.constant 1.000000e+00 : f32
    %140 = vector.broadcast %cst_67 : f32 to vector<2x16xf32>
    %141 = arith.addf %140, %139 : vector<2x16xf32>
    %142 = arith.divf %140, %141 : vector<2x16xf32>
    %143 = arith.mulf %134, %100 : vector<2x16xf32>
    %144 = arith.mulf %128, %136 : vector<2x16xf32>
    %145 = arith.addf %143, %144 : vector<2x16xf32>
    %146 = math.tanh %145 : vector<2x16xf32>
    %147 = arith.mulf %142, %146 : vector<2x16xf32>
    %c0_68 = arith.constant 0 : index
    %c0_69 = arith.constant 0 : index
    %148 = arith.index_cast %116 : i32 to index
    %c0_70 = arith.constant 0 : index
    %c0_71 = arith.constant 0 : index
    %149 = vector.load %arg3[%c0_68, %c0_69, %148, %c0_70, %c0_71] : memref<1x1x8x2x16xbf16, #tpu.memory_space<vmem>>, vector<1x1x1x2x16xbf16>
    %150 = vector.shape_cast %149 : vector<1x1x1x2x16xbf16> to vector<2x16xbf16>
    %151 = arith.extf %150 : vector<2x16xbf16> to vector<2x16xf32>
    %152 = arith.addf %147, %151 : vector<2x16xf32>
    %153 = arith.truncf %152 : vector<2x16xf32> to vector<2x16xbf16>
    %c0_72 = arith.constant 0 : index
    %c0_73 = arith.constant 0 : index
    %154 = arith.index_cast %116 : i32 to index
    %c0_74 = arith.constant 0 : index
    %c0_75 = arith.constant 0 : index
    %155 = vector.load %arg7[%c0_72, %c0_73, %154, %c0_74, %c0_75] : memref<1x1x8x2x16xbf16, #tpu.memory_space<vmem>>, vector<1x1x1x2x16xbf16>
    %156 = vector.shape_cast %155 : vector<1x1x1x2x16xbf16> to vector<2x16xbf16>
    %157 = vector.shape_cast %153 : vector<2x16xbf16> to vector<1x1x1x2x16xbf16>
    tpu.vector_store %arg7[%c0_72, %c0_73, %154, %c0_74, %c0_75], %157 {strides = array<i32>} : memref<1x1x8x2x16xbf16, #tpu.memory_space<vmem>>, vector<1x1x1x2x16xbf16>,
    %c3_i32 = arith.constant 3 : i32
    %c2_i32_76 = arith.constant 2 : i32
    %158 = arith.muli %c2_i32_76, %c3_i32 : i32
    %c7_i32_77 = arith.constant 7 : i32
    %159 = arith.subi %c7_i32_77, %158 : i32
    %160 = arith.muli %arg0, %159 : i32
    %161 = arith.addi %c3_i32, %160 : i32
    %c2_i32_78 = arith.constant 2 : i32
    %162 = arith.muli %161, %c2_i32_78 : i32
    %163 = arith.index_cast %162 : i32 to index
    %c0_79 = arith.constant 0 : index
    %164 = vector.load %arg8[%163, %c0_79] : memref<16x64xf32, #tpu.memory_space<vmem>>, vector<2x64xf32>
    %165 = arith.truncf %147 : vector<2x16xf32> to vector<2x16xbf16>
    %cst_80 = arith.constant dense<0.000000e+00> : vector<2x64xf32>
    %166 = tpu.matmul %165, %20, %cst_80 {dimension_numbers = #tpu.dot_dimension_numbers<[1], [0], [0], [1], [0, 0, 1, 1], [], []>} : vector<2x16xbf16>, vector<16x64xbf16>, vector<2x64xf32> -> vector<2x64xf32>
    %167 = arith.addf %164, %166 : vector<2x64xf32>
    %168 = vector.extract_strided_slice %167 {offsets = [0, 0], sizes = [2, 16], strides = [1, 1]} : vector<2x64xf32> to vector<2x16xf32>
    %169 = arith.negf %168 : vector<2x16xf32>
    %170 = math.exp %169 : vector<2x16xf32>
    %cst_81 = arith.constant 1.000000e+00 : f32
    %171 = vector.broadcast %cst_81 : f32 to vector<2x16xf32>
    %172 = arith.addf %171, %170 : vector<2x16xf32>
    %173 = arith.divf %171, %172 : vector<2x16xf32>
    %174 = vector.extract_strided_slice %167 {offsets = [0, 16], sizes = [2, 16], strides = [1, 1]} : vector<2x64xf32> to vector<2x16xf32>
    %175 = arith.negf %174 : vector<2x16xf32>
    %176 = math.exp %175 : vector<2x16xf32>
    %cst_82 = arith.constant 1.000000e+00 : f32
    %177 = vector.broadcast %cst_82 : f32 to vector<2x16xf32>
    %178 = arith.addf %177, %176 : vector<2x16xf32>
    %179 = arith.divf %177, %178 : vector<2x16xf32>
    %180 = vector.extract_strided_slice %167 {offsets = [0, 32], sizes = [2, 16], strides = [1, 1]} : vector<2x64xf32> to vector<2x16xf32>
    %181 = math.tanh %180 : vector<2x16xf32>
    %182 = vector.extract_strided_slice %167 {offsets = [0, 48], sizes = [2, 16], strides = [1, 1]} : vector<2x64xf32> to vector<2x16xf32>
    %183 = arith.negf %182 : vector<2x16xf32>
    %184 = math.exp %183 : vector<2x16xf32>
    %cst_83 = arith.constant 1.000000e+00 : f32
    %185 = vector.broadcast %cst_83 : f32 to vector<2x16xf32>
    %186 = arith.addf %185, %184 : vector<2x16xf32>
    %187 = arith.divf %185, %186 : vector<2x16xf32>
    %188 = arith.mulf %179, %145 : vector<2x16xf32>
    %189 = arith.mulf %173, %181 : vector<2x16xf32>
    %190 = arith.addf %188, %189 : vector<2x16xf32>
    %191 = math.tanh %190 : vector<2x16xf32>
    %192 = arith.mulf %187, %191 : vector<2x16xf32>
    %c0_84 = arith.constant 0 : index
    %c0_85 = arith.constant 0 : index
    %193 = arith.index_cast %161 : i32 to index
    %c0_86 = arith.constant 0 : index
    %c0_87 = arith.constant 0 : index
    %194 = vector.load %arg3[%c0_84, %c0_85, %193, %c0_86, %c0_87] : memref<1x1x8x2x16xbf16, #tpu.memory_space<vmem>>, vector<1x1x1x2x16xbf16>
    %195 = vector.shape_cast %194 : vector<1x1x1x2x16xbf16> to vector<2x16xbf16>
    %196 = arith.extf %195 : vector<2x16xbf16> to vector<2x16xf32>
    %197 = arith.addf %192, %196 : vector<2x16xf32>
    %198 = arith.truncf %197 : vector<2x16xf32> to vector<2x16xbf16>
    %c0_88 = arith.constant 0 : index
    %c0_89 = arith.constant 0 : index
    %199 = arith.index_cast %161 : i32 to index
    %c0_90 = arith.constant 0 : index
    %c0_91 = arith.constant 0 : index
    %200 = vector.load %arg7[%c0_88, %c0_89, %199, %c0_90, %c0_91] : memref<1x1x8x2x16xbf16, #tpu.memory_space<vmem>>, vector<1x1x1x2x16xbf16>
    %201 = vector.shape_cast %200 : vector<1x1x1x2x16xbf16> to vector<2x16xbf16>
    %202 = vector.shape_cast %198 : vector<2x16xbf16> to vector<1x1x1x2x16xbf16>
    tpu.vector_store %arg7[%c0_88, %c0_89, %199, %c0_90, %c0_91], %202 {strides = array<i32>} : memref<1x1x8x2x16xbf16, #tpu.memory_space<vmem>>, vector<1x1x1x2x16xbf16>,
    %c4_i32 = arith.constant 4 : i32
    %c2_i32_92 = arith.constant 2 : i32
    %203 = arith.muli %c2_i32_92, %c4_i32 : i32
    %c7_i32_93 = arith.constant 7 : i32
    %204 = arith.subi %c7_i32_93, %203 : i32
    %205 = arith.muli %arg0, %204 : i32
    %206 = arith.addi %c4_i32, %205 : i32
    %c2_i32_94 = arith.constant 2 : i32
    %207 = arith.muli %206, %c2_i32_94 : i32
    %208 = arith.index_cast %207 : i32 to index
    %c0_95 = arith.constant 0 : index
    %209 = vector.load %arg8[%208, %c0_95] : memref<16x64xf32, #tpu.memory_space<vmem>>, vector<2x64xf32>
    %210 = arith.truncf %192 : vector<2x16xf32> to vector<2x16xbf16>
    %cst_96 = arith.constant dense<0.000000e+00> : vector<2x64xf32>
    %211 = tpu.matmul %210, %20, %cst_96 {dimension_numbers = #tpu.dot_dimension_numbers<[1], [0], [0], [1], [0, 0, 1, 1], [], []>} : vector<2x16xbf16>, vector<16x64xbf16>, vector<2x64xf32> -> vector<2x64xf32>
    %212 = arith.addf %209, %211 : vector<2x64xf32>
    %213 = vector.extract_strided_slice %212 {offsets = [0, 0], sizes = [2, 16], strides = [1, 1]} : vector<2x64xf32> to vector<2x16xf32>
    %214 = arith.negf %213 : vector<2x16xf32>
    %215 = math.exp %214 : vector<2x16xf32>
    %cst_97 = arith.constant 1.000000e+00 : f32
    %216 = vector.broadcast %cst_97 : f32 to vector<2x16xf32>
    %217 = arith.addf %216, %215 : vector<2x16xf32>
    %218 = arith.divf %216, %217 : vector<2x16xf32>
    %219 = vector.extract_strided_slice %212 {offsets = [0, 16], sizes = [2, 16], strides = [1, 1]} : vector<2x64xf32> to vector<2x16xf32>
    %220 = arith.negf %219 : vector<2x16xf32>
    %221 = math.exp %220 : vector<2x16xf32>
    %cst_98 = arith.constant 1.000000e+00 : f32
    %222 = vector.broadcast %cst_98 : f32 to vector<2x16xf32>
    %223 = arith.addf %222, %221 : vector<2x16xf32>
    %224 = arith.divf %222, %223 : vector<2x16xf32>
    %225 = vector.extract_strided_slice %212 {offsets = [0, 32], sizes = [2, 16], strides = [1, 1]} : vector<2x64xf32> to vector<2x16xf32>
    %226 = math.tanh %225 : vector<2x16xf32>
    %227 = vector.extract_strided_slice %212 {offsets = [0, 48], sizes = [2, 16], strides = [1, 1]} : vector<2x64xf32> to vector<2x16xf32>
    %228 = arith.negf %227 : vector<2x16xf32>
    %229 = math.exp %228 : vector<2x16xf32>
    %cst_99 = arith.constant 1.000000e+00 : f32
    %230 = vector.broadcast %cst_99 : f32 to vector<2x16xf32>
    %231 = arith.addf %230, %229 : vector<2x16xf32>
    %232 = arith.divf %230, %231 : vector<2x16xf32>
    %233 = arith.mulf %224, %190 : vector<2x16xf32>
    %234 = arith.mulf %218, %226 : vector<2x16xf32>
    %235 = arith.addf %233, %234 : vector<2x16xf32>
    %236 = math.tanh %235 : vector<2x16xf32>
    %237 = arith.mulf %232, %236 : vector<2x16xf32>
    %c0_100 = arith.constant 0 : index
    %c0_101 = arith.constant 0 : index
    %238 = arith.index_cast %206 : i32 to index
    %c0_102 = arith.constant 0 : index
    %c0_103 = arith.constant 0 : index
    %239 = vector.load %arg3[%c0_100, %c0_101, %238, %c0_102, %c0_103] : memref<1x1x8x2x16xbf16, #tpu.memory_space<vmem>>, vector<1x1x1x2x16xbf16>
    %240 = vector.shape_cast %239 : vector<1x1x1x2x16xbf16> to vector<2x16xbf16>
    %241 = arith.extf %240 : vector<2x16xbf16> to vector<2x16xf32>
    %242 = arith.addf %237, %241 : vector<2x16xf32>
    %243 = arith.truncf %242 : vector<2x16xf32> to vector<2x16xbf16>
    %c0_104 = arith.constant 0 : index
    %c0_105 = arith.constant 0 : index
    %244 = arith.index_cast %206 : i32 to index
    %c0_106 = arith.constant 0 : index
    %c0_107 = arith.constant 0 : index
    %245 = vector.load %arg7[%c0_104, %c0_105, %244, %c0_106, %c0_107] : memref<1x1x8x2x16xbf16, #tpu.memory_space<vmem>>, vector<1x1x1x2x16xbf16>
    %246 = vector.shape_cast %245 : vector<1x1x1x2x16xbf16> to vector<2x16xbf16>
    %247 = vector.shape_cast %243 : vector<2x16xbf16> to vector<1x1x1x2x16xbf16>
    tpu.vector_store %arg7[%c0_104, %c0_105, %244, %c0_106, %c0_107], %247 {strides = array<i32>} : memref<1x1x8x2x16xbf16, #tpu.memory_space<vmem>>, vector<1x1x1x2x16xbf16>,
    %c5_i32 = arith.constant 5 : i32
    %c2_i32_108 = arith.constant 2 : i32
    %248 = arith.muli %c2_i32_108, %c5_i32 : i32
    %c7_i32_109 = arith.constant 7 : i32
    %249 = arith.subi %c7_i32_109, %248 : i32
    %250 = arith.muli %arg0, %249 : i32
    %251 = arith.addi %c5_i32, %250 : i32
    %c2_i32_110 = arith.constant 2 : i32
    %252 = arith.muli %251, %c2_i32_110 : i32
    %253 = arith.index_cast %252 : i32 to index
    %c0_111 = arith.constant 0 : index
    %254 = vector.load %arg8[%253, %c0_111] : memref<16x64xf32, #tpu.memory_space<vmem>>, vector<2x64xf32>
    %255 = arith.truncf %237 : vector<2x16xf32> to vector<2x16xbf16>
    %cst_112 = arith.constant dense<0.000000e+00> : vector<2x64xf32>
    %256 = tpu.matmul %255, %20, %cst_112 {dimension_numbers = #tpu.dot_dimension_numbers<[1], [0], [0], [1], [0, 0, 1, 1], [], []>} : vector<2x16xbf16>, vector<16x64xbf16>, vector<2x64xf32> -> vector<2x64xf32>
    %257 = arith.addf %254, %256 : vector<2x64xf32>
    %258 = vector.extract_strided_slice %257 {offsets = [0, 0], sizes = [2, 16], strides = [1, 1]} : vector<2x64xf32> to vector<2x16xf32>
    %259 = arith.negf %258 : vector<2x16xf32>
    %260 = math.exp %259 : vector<2x16xf32>
    %cst_113 = arith.constant 1.000000e+00 : f32
    %261 = vector.broadcast %cst_113 : f32 to vector<2x16xf32>
    %262 = arith.addf %261, %260 : vector<2x16xf32>
    %263 = arith.divf %261, %262 : vector<2x16xf32>
    %264 = vector.extract_strided_slice %257 {offsets = [0, 16], sizes = [2, 16], strides = [1, 1]} : vector<2x64xf32> to vector<2x16xf32>
    %265 = arith.negf %264 : vector<2x16xf32>
    %266 = math.exp %265 : vector<2x16xf32>
    %cst_114 = arith.constant 1.000000e+00 : f32
    %267 = vector.broadcast %cst_114 : f32 to vector<2x16xf32>
    %268 = arith.addf %267, %266 : vector<2x16xf32>
    %269 = arith.divf %267, %268 : vector<2x16xf32>
    %270 = vector.extract_strided_slice %257 {offsets = [0, 32], sizes = [2, 16], strides = [1, 1]} : vector<2x64xf32> to vector<2x16xf32>
    %271 = math.tanh %270 : vector<2x16xf32>
    %272 = vector.extract_strided_slice %257 {offsets = [0, 48], sizes = [2, 16], strides = [1, 1]} : vector<2x64xf32> to vector<2x16xf32>
    %273 = arith.negf %272 : vector<2x16xf32>
    %274 = math.exp %273 : vector<2x16xf32>
    %cst_115 = arith.constant 1.000000e+00 : f32
    %275 = vector.broadcast %cst_115 : f32 to vector<2x16xf32>
    %276 = arith.addf %275, %274 : vector<2x16xf32>
    %277 = arith.divf %275, %276 : vector<2x16xf32>
    %278 = arith.mulf %269, %235 : vector<2x16xf32>
    %279 = arith.mulf %263, %271 : vector<2x16xf32>
    %280 = arith.addf %278, %279 : vector<2x16xf32>
    %281 = math.tanh %280 : vector<2x16xf32>
    %282 = arith.mulf %277, %281 : vector<2x16xf32>
    %c0_116 = arith.constant 0 : index
    %c0_117 = arith.constant 0 : index
    %283 = arith.index_cast %251 : i32 to index
    %c0_118 = arith.constant 0 : index
    %c0_119 = arith.constant 0 : index
    %284 = vector.load %arg3[%c0_116, %c0_117, %283, %c0_118, %c0_119] : memref<1x1x8x2x16xbf16, #tpu.memory_space<vmem>>, vector<1x1x1x2x16xbf16>
    %285 = vector.shape_cast %284 : vector<1x1x1x2x16xbf16> to vector<2x16xbf16>
    %286 = arith.extf %285 : vector<2x16xbf16> to vector<2x16xf32>
    %287 = arith.addf %282, %286 : vector<2x16xf32>
    %288 = arith.truncf %287 : vector<2x16xf32> to vector<2x16xbf16>
    %c0_120 = arith.constant 0 : index
    %c0_121 = arith.constant 0 : index
    %289 = arith.index_cast %251 : i32 to index
    %c0_122 = arith.constant 0 : index
    %c0_123 = arith.constant 0 : index
    %290 = vector.load %arg7[%c0_120, %c0_121, %289, %c0_122, %c0_123] : memref<1x1x8x2x16xbf16, #tpu.memory_space<vmem>>, vector<1x1x1x2x16xbf16>
    %291 = vector.shape_cast %290 : vector<1x1x1x2x16xbf16> to vector<2x16xbf16>
    %292 = vector.shape_cast %288 : vector<2x16xbf16> to vector<1x1x1x2x16xbf16>
    tpu.vector_store %arg7[%c0_120, %c0_121, %289, %c0_122, %c0_123], %292 {strides = array<i32>} : memref<1x1x8x2x16xbf16, #tpu.memory_space<vmem>>, vector<1x1x1x2x16xbf16>,
    %c6_i32 = arith.constant 6 : i32
    %c2_i32_124 = arith.constant 2 : i32
    %293 = arith.muli %c2_i32_124, %c6_i32 : i32
    %c7_i32_125 = arith.constant 7 : i32
    %294 = arith.subi %c7_i32_125, %293 : i32
    %295 = arith.muli %arg0, %294 : i32
    %296 = arith.addi %c6_i32, %295 : i32
    %c2_i32_126 = arith.constant 2 : i32
    %297 = arith.muli %296, %c2_i32_126 : i32
    %298 = arith.index_cast %297 : i32 to index
    %c0_127 = arith.constant 0 : index
    %299 = vector.load %arg8[%298, %c0_127] : memref<16x64xf32, #tpu.memory_space<vmem>>, vector<2x64xf32>
    %300 = arith.truncf %282 : vector<2x16xf32> to vector<2x16xbf16>
    %cst_128 = arith.constant dense<0.000000e+00> : vector<2x64xf32>
    %301 = tpu.matmul %300, %20, %cst_128 {dimension_numbers = #tpu.dot_dimension_numbers<[1], [0], [0], [1], [0, 0, 1, 1], [], []>} : vector<2x16xbf16>, vector<16x64xbf16>, vector<2x64xf32> -> vector<2x64xf32>
    %302 = arith.addf %299, %301 : vector<2x64xf32>
    %303 = vector.extract_strided_slice %302 {offsets = [0, 0], sizes = [2, 16], strides = [1, 1]} : vector<2x64xf32> to vector<2x16xf32>
    %304 = arith.negf %303 : vector<2x16xf32>
    %305 = math.exp %304 : vector<2x16xf32>
    %cst_129 = arith.constant 1.000000e+00 : f32
    %306 = vector.broadcast %cst_129 : f32 to vector<2x16xf32>
    %307 = arith.addf %306, %305 : vector<2x16xf32>
    %308 = arith.divf %306, %307 : vector<2x16xf32>
    %309 = vector.extract_strided_slice %302 {offsets = [0, 16], sizes = [2, 16], strides = [1, 1]} : vector<2x64xf32> to vector<2x16xf32>
    %310 = arith.negf %309 : vector<2x16xf32>
    %311 = math.exp %310 : vector<2x16xf32>
    %cst_130 = arith.constant 1.000000e+00 : f32
    %312 = vector.broadcast %cst_130 : f32 to vector<2x16xf32>
    %313 = arith.addf %312, %311 : vector<2x16xf32>
    %314 = arith.divf %312, %313 : vector<2x16xf32>
    %315 = vector.extract_strided_slice %302 {offsets = [0, 32], sizes = [2, 16], strides = [1, 1]} : vector<2x64xf32> to vector<2x16xf32>
    %316 = math.tanh %315 : vector<2x16xf32>
    %317 = vector.extract_strided_slice %302 {offsets = [0, 48], sizes = [2, 16], strides = [1, 1]} : vector<2x64xf32> to vector<2x16xf32>
    %318 = arith.negf %317 : vector<2x16xf32>
    %319 = math.exp %318 : vector<2x16xf32>
    %cst_131 = arith.constant 1.000000e+00 : f32
    %320 = vector.broadcast %cst_131 : f32 to vector<2x16xf32>
    %321 = arith.addf %320, %319 : vector<2x16xf32>
    %322 = arith.divf %320, %321 : vector<2x16xf32>
    %323 = arith.mulf %314, %280 : vector<2x16xf32>
    %324 = arith.mulf %308, %316 : vector<2x16xf32>
    %325 = arith.addf %323, %324 : vector<2x16xf32>
    %326 = math.tanh %325 : vector<2x16xf32>
    %327 = arith.mulf %322, %326 : vector<2x16xf32>
    %c0_132 = arith.constant 0 : index
    %c0_133 = arith.constant 0 : index
    %328 = arith.index_cast %296 : i32 to index
    %c0_134 = arith.constant 0 : index
    %c0_135 = arith.constant 0 : index
    %329 = vector.load %arg3[%c0_132, %c0_133, %328, %c0_134, %c0_135] : memref<1x1x8x2x16xbf16, #tpu.memory_space<vmem>>, vector<1x1x1x2x16xbf16>
    %330 = vector.shape_cast %329 : vector<1x1x1x2x16xbf16> to vector<2x16xbf16>
    %331 = arith.extf %330 : vector<2x16xbf16> to vector<2x16xf32>
    %332 = arith.addf %327, %331 : vector<2x16xf32>
    %333 = arith.truncf %332 : vector<2x16xf32> to vector<2x16xbf16>
    %c0_136 = arith.constant 0 : index
    %c0_137 = arith.constant 0 : index
    %334 = arith.index_cast %296 : i32 to index
    %c0_138 = arith.constant 0 : index
    %c0_139 = arith.constant 0 : index
    %335 = vector.load %arg7[%c0_136, %c0_137, %334, %c0_138, %c0_139] : memref<1x1x8x2x16xbf16, #tpu.memory_space<vmem>>, vector<1x1x1x2x16xbf16>
    %336 = vector.shape_cast %335 : vector<1x1x1x2x16xbf16> to vector<2x16xbf16>
    %337 = vector.shape_cast %333 : vector<2x16xbf16> to vector<1x1x1x2x16xbf16>
    tpu.vector_store %arg7[%c0_136, %c0_137, %334, %c0_138, %c0_139], %337 {strides = array<i32>} : memref<1x1x8x2x16xbf16, #tpu.memory_space<vmem>>, vector<1x1x1x2x16xbf16>,
    %c7_i32_140 = arith.constant 7 : i32
    %c2_i32_141 = arith.constant 2 : i32
    %338 = arith.muli %c2_i32_141, %c7_i32_140 : i32
    %c7_i32_142 = arith.constant 7 : i32
    %339 = arith.subi %c7_i32_142, %338 : i32
    %340 = arith.muli %arg0, %339 : i32
    %341 = arith.addi %c7_i32_140, %340 : i32
    %c2_i32_143 = arith.constant 2 : i32
    %342 = arith.muli %341, %c2_i32_143 : i32
    %343 = arith.index_cast %342 : i32 to index
    %c0_144 = arith.constant 0 : index
    %344 = vector.load %arg8[%343, %c0_144] : memref<16x64xf32, #tpu.memory_space<vmem>>, vector<2x64xf32>
    %345 = arith.truncf %327 : vector<2x16xf32> to vector<2x16xbf16>
    %cst_145 = arith.constant dense<0.000000e+00> : vector<2x64xf32>
    %346 = tpu.matmul %345, %20, %cst_145 {dimension_numbers = #tpu.dot_dimension_numbers<[1], [0], [0], [1], [0, 0, 1, 1], [], []>} : vector<2x16xbf16>, vector<16x64xbf16>, vector<2x64xf32> -> vector<2x64xf32>
    %347 = arith.addf %344, %346 : vector<2x64xf32>
    %348 = vector.extract_strided_slice %347 {offsets = [0, 0], sizes = [2, 16], strides = [1, 1]} : vector<2x64xf32> to vector<2x16xf32>
    %349 = arith.negf %348 : vector<2x16xf32>
    %350 = math.exp %349 : vector<2x16xf32>
    %cst_146 = arith.constant 1.000000e+00 : f32
    %351 = vector.broadcast %cst_146 : f32 to vector<2x16xf32>
    %352 = arith.addf %351, %350 : vector<2x16xf32>
    %353 = arith.divf %351, %352 : vector<2x16xf32>
    %354 = vector.extract_strided_slice %347 {offsets = [0, 16], sizes = [2, 16], strides = [1, 1]} : vector<2x64xf32> to vector<2x16xf32>
    %355 = arith.negf %354 : vector<2x16xf32>
    %356 = math.exp %355 : vector<2x16xf32>
    %cst_147 = arith.constant 1.000000e+00 : f32
    %357 = vector.broadcast %cst_147 : f32 to vector<2x16xf32>
    %358 = arith.addf %357, %356 : vector<2x16xf32>
    %359 = arith.divf %357, %358 : vector<2x16xf32>
    %360 = vector.extract_strided_slice %347 {offsets = [0, 32], sizes = [2, 16], strides = [1, 1]} : vector<2x64xf32> to vector<2x16xf32>
    %361 = math.tanh %360 : vector<2x16xf32>
    %362 = vector.extract_strided_slice %347 {offsets = [0, 48], sizes = [2, 16], strides = [1, 1]} : vector<2x64xf32> to vector<2x16xf32>
    %363 = arith.negf %362 : vector<2x16xf32>
    %364 = math.exp %363 : vector<2x16xf32>
    %cst_148 = arith.constant 1.000000e+00 : f32
    %365 = vector.broadcast %cst_148 : f32 to vector<2x16xf32>
    %366 = arith.addf %365, %364 : vector<2x16xf32>
    %367 = arith.divf %365, %366 : vector<2x16xf32>
    %368 = arith.mulf %359, %325 : vector<2x16xf32>
    %369 = arith.mulf %353, %361 : vector<2x16xf32>
    %370 = arith.addf %368, %369 : vector<2x16xf32>
    %371 = math.tanh %370 : vector<2x16xf32>
    %372 = arith.mulf %367, %371 : vector<2x16xf32>
    %c0_149 = arith.constant 0 : index
    %c0_150 = arith.constant 0 : index
    %373 = arith.index_cast %341 : i32 to index
    %c0_151 = arith.constant 0 : index
    %c0_152 = arith.constant 0 : index
    %374 = vector.load %arg3[%c0_149, %c0_150, %373, %c0_151, %c0_152] : memref<1x1x8x2x16xbf16, #tpu.memory_space<vmem>>, vector<1x1x1x2x16xbf16>
    %375 = vector.shape_cast %374 : vector<1x1x1x2x16xbf16> to vector<2x16xbf16>
    %376 = arith.extf %375 : vector<2x16xbf16> to vector<2x16xf32>
    %377 = arith.addf %372, %376 : vector<2x16xf32>
    %378 = arith.truncf %377 : vector<2x16xf32> to vector<2x16xbf16>
    %c0_153 = arith.constant 0 : index
    %c0_154 = arith.constant 0 : index
    %379 = arith.index_cast %341 : i32 to index
    %c0_155 = arith.constant 0 : index
    %c0_156 = arith.constant 0 : index
    %380 = vector.load %arg7[%c0_153, %c0_154, %379, %c0_155, %c0_156] : memref<1x1x8x2x16xbf16, #tpu.memory_space<vmem>>, vector<1x1x1x2x16xbf16>
    %381 = vector.shape_cast %380 : vector<1x1x1x2x16xbf16> to vector<2x16xbf16>
    %382 = vector.shape_cast %378 : vector<2x16xbf16> to vector<1x1x1x2x16xbf16>
    tpu.vector_store %arg7[%c0_153, %c0_154, %379, %c0_155, %c0_156], %382 {strides = array<i32>} : memref<1x1x8x2x16xbf16, #tpu.memory_space<vmem>>, vector<1x1x1x2x16xbf16>,
    %c8_i32 = arith.constant 8 : i32
    %c0_157 = arith.constant 0 : index
    %c0_158 = arith.constant 0 : index
    %383 = vector.load %arg9[%c0_157, %c0_158] : memref<2x16xf32, #tpu.memory_space<vmem>>, vector<2x16xf32>
    tpu.vector_store %arg9[%c0_157, %c0_158], %372 {strides = array<i32>} : memref<2x16xf32, #tpu.memory_space<vmem>>, vector<2x16xf32>,
    %c0_159 = arith.constant 0 : index
    %c0_160 = arith.constant 0 : index
    %384 = vector.load %arg10[%c0_159, %c0_160] : memref<2x16xf32, #tpu.memory_space<vmem>>, vector<2x16xf32>
    tpu.vector_store %arg10[%c0_159, %c0_160], %370 {strides = array<i32>} : memref<2x16xf32, #tpu.memory_space<vmem>>, vector<2x16xf32>,
    return
  }
  func.func @transform_0(%arg0: i32, %arg1: i32) -> (i32, i32, i32, i32) {
    %c2_i32 = arith.constant 2 : i32
    %0 = arith.muli %c2_i32, %arg1 : i32
    %c0_i32 = arith.constant 0 : i32
    %1 = arith.subi %c0_i32, %0 : i32
    %2 = arith.muli %arg0, %1 : i32
    %3 = arith.addi %arg1, %2 : i32
    %c0_i32_0 = arith.constant 0 : i32
    %c0_i32_1 = arith.constant 0 : i32
    %c0_i32_2 = arith.constant 0 : i32
    %c0_i32_3 = arith.constant 0 : i32
    return %3, %c0_i32_0, %c0_i32_1, %c0_i32_2 : i32, i32, i32, i32
  }
  func.func @transform_1(%arg0: i32, %arg1: i32) -> (i32, i32, i32, i32, i32) {
    %c2_i32 = arith.constant 2 : i32
    %0 = arith.muli %c2_i32, %arg1 : i32
    %c0_i32 = arith.constant 0 : i32
    %1 = arith.subi %c0_i32, %0 : i32
    %2 = arith.muli %arg0, %1 : i32
    %3 = arith.addi %arg1, %2 : i32
    %c0_i32_0 = arith.constant 0 : i32
    %c0_i32_1 = arith.constant 0 : i32
    %c0_i32_2 = arith.constant 0 : i32
    %c0_i32_3 = arith.constant 0 : i32
    return %3, %arg0, %c0_i32_0, %c0_i32_1, %c0_i32_2 : i32, i32, i32, i32, i32
  }
  func.func @transform_2(%arg0: i32, %arg1: i32) -> (i32, i32, i32, i32) {
    %c0_i32 = arith.constant 0 : i32
    %c0_i32_0 = arith.constant 0 : i32
    %c0_i32_1 = arith.constant 0 : i32
    %c0_i32_2 = arith.constant 0 : i32
    return %arg0, %c0_i32, %c0_i32_0, %c0_i32_1 : i32, i32, i32, i32
  }
  func.func @transform_3(%arg0: i32, %arg1: i32) -> (i32, i32, i32) {
    %c0_i32 = arith.constant 0 : i32
    %c0_i32_0 = arith.constant 0 : i32
    %c0_i32_1 = arith.constant 0 : i32
    return %arg0, %c0_i32, %c0_i32_0 : i32, i32, i32
  }
  func.func @transform_4(%arg0: i32, %arg1: i32) -> (i32, i32, i32) {
    %c0_i32 = arith.constant 0 : i32
    %c0_i32_0 = arith.constant 0 : i32
    %c0_i32_1 = arith.constant 0 : i32
    return %arg0, %c0_i32, %c0_i32_0 : i32, i32, i32
  }
  func.func @transform_5(%arg0: i32, %arg1: i32) -> (i32, i32, i32, i32, i32) {
    %c2_i32 = arith.constant 2 : i32
    %0 = arith.muli %c2_i32, %arg1 : i32
    %c0_i32 = arith.constant 0 : i32
    %1 = arith.subi %c0_i32, %0 : i32
    %2 = arith.muli %arg0, %1 : i32
    %3 = arith.addi %arg1, %2 : i32
    %c0_i32_0 = arith.constant 0 : i32
    %c0_i32_1 = arith.constant 0 : i32
    %c0_i32_2 = arith.constant 0 : i32
    %c0_i32_3 = arith.constant 0 : i32
    return %3, %arg0, %c0_i32_0, %c0_i32_1, %c0_i32_2 : i32, i32, i32, i32, i32
  }
}

</mosaic_0001>

<bundles_post_ra>
// kernel: lstm_encoder.2
= control target key start
LH: loop header
LB: loop body
LE: loop exit
PB: predicated region body
PF: predicated region fallthrough
CT: control target
= control target key end

     0   :  { %s1644_s18 = smov 0   ;;  %s1646_s19 = smov 0   ;;  %s1892_s0 = inlined_call_operand.vmem [shape: bf16[1,2,16,16], index: 0, kind: input, shape index: {}, may-alias: {0,1}]   ;;  %s1893_s1 = inlined_call_operand.vmem [shape: bf16[1,2,8,2,16], index: 1, kind: input, shape index: {}, may-alias: {0,1}]   ;;  %s1894_s2 = inlined_call_operand.vmem [shape: bf16[2,2,16,64], index: 2, kind: input, shape index: {}]   ;;  %s1895_s3 = inlined_call_operand.vmem [shape: bf16[2,16,64], index: 3, kind: input, shape index: {}]   ;;  %s1896_s4 = inlined_call_operand.vmem [shape: f32[2,1,64], index: 4, kind: input, shape index: {}]   ;;  %s1897_s5 = inlined_call_operand.vmem [shape: bf16[1,2,8,2,16], index: 5, kind: output, shape index: {}]  }
   0x1   :  { %s1648_s20 = smov 0  }
   0x2 LB: > { %s27_s21 = sadd.s32 1, %s1601_s19  ;;  %p1404_p0 = scmp.ge.s32.totalorder %s1605_s20, 1  ;;  %s1605_s20 = sphi %s1648_s20, %s15_s20   ;;  %s1601_s19 = sphi %s1646_s19, %s1899_s19   ;;  %s1597_s18 = sphi %s1644_s18, %s1898_s18  }
   0x3   : > { %p29_p1 = scmp.ge.s32.totalorder %s27_s21, 2  ;;  %p284_p2 = scmp.lt.s32.totalorder %s1605_s20, 3 }
   0x5   : > { %s1901_s21 = smov (%p29_p1, %s27_s21), 0  ;;  %p285_p3 = pnand %p1404_p0, %p284_p2 }
   0x6   : > { %p367_p4 = scmp.lt.s32.totalorder (!%p285_p3), %s1597_s18, 1  ;;  %s494_s23 = smul.u32 (!%p285_p3), 7, %s1597_s18 }
   0x7   : > { %288 = sbr.rel (%p285_p3) target bundleno = 4697 (0x1259), region = 40  ;;  %s1608_s26 = smov (!%p285_p3), 96  }
   0x8   : > { %s1609_s27 = smov (!%p285_p3), 16   ;;  %s1610_s29 = smov (!%p285_p3), 32  }
   0x9   : > { %s1611_s30 = smov (!%p285_p3), 80   ;;  %s1445_s8 = smul.u32 (!%p285_p3), 6, %s1597_s18 }
   0xa   : > { %s1746_s12 = ssub.s32 (!%p285_p3), 4, %s1597_s18  ;;  %s1460_s15 = smul.u32 (!%p285_p3), 4294967290, %s1597_s18 }
   0xb   : > { %s1457_s13 = sshll.u32 (!%p285_p3), %s1746_s12, 1 }
   0xc   : > { %vm411_vm0 = vcmask 123904   ;;  %s1666_s22 = scalar_select %p367_p4, %s1597_s18, 1  ;;  %v1607_v0 = vmov 0.0   ;;  %v1484_v4 = vld [vmem:[%s1892_s0 + $0x8] sm:$0xff]  ;;  %v1482_v5 = vld [vmem:[%s1892_s0] sm:$0xff]  ;;  %vm435_vm1 = vcmask 130048  }
   0xd   : > { %412 = vst.msk [vmem:[#allocation3] sm:$0x3] %vm411_vm0, %v1607_v0  ;;  %vm487_vm2 = vcmask 523264   ;;  %s843_s14 = scalar_lea.vmem [#allocation2], %s1457_s13  ;;  %s1310_s16 = scalar_lea.vmem [#allocation2], %s1460_s15 }
   0xe   : > { %413 = vst.msk [vmem:[#allocation4] sm:$0x3] %vm411_vm0, %v1607_v0  ;;  %s1672_s24 = sshll.u32 %s1666_s22, 3  ;;  %s1480_s25 = sshll.u32 %s1666_s22, 4 }
   0xf   : > { %s1679_s28 = scalar_lea.vmem %s1893_s1, %s1672_s24  ;;  %s381_s6 = scalar_lea.vmem %s1894_s2, %s1480_s25 }
  0x10   : > { %s386_s9 = scalar_lea.vmem %s1895_s3, %s1672_s24  ;;  %v1485_v1 = vld [vmem:[%s381_s6 + $0x8] sm:$0xff]  ;;  %v1483_v2 = vld [vmem:[%s381_s6] sm:$0xff]  ;;  %s563_s10 = scalar_lea.vmem %s1679_s28, %s494_s23 }
  0x11   : > { %v1486_v3 = vld [vmem:[%s386_s9] sm:$0xff]  ;;  %446 = vmatpush.bf16.msra.mxu0 %v1485_v1  ;;  %474 = vmatpush.bf16.msra.mxu1 %v1483_v2  ;;  %s389_s17 = scalar_lea.vmem %s1896_s4, %s1666_s22  ;;  %s495_s22 = smul.u32 14, %s1597_s18 }
  0x12   : > { %v564_v6 = vld [vmem:[%s563_s10] sm:$0x1]  ;;  %515 = vmatpush.bf16.msra.mxu2 %v1486_v3  ;;  %606 = vmatpush.bf16.msra.mxu3 %v1486_v3  ;;  %s1439_s6 = smul.u32 10, %s1597_s18  ;;  %s1289_s9 = scalar_lea.vmem [#allocation2], %s1445_s8 }
  0x13   : > { %v565_v7 = vunpack.c.l.bf16 %v564_v6  ;;  %v1518_v10 = vld [vmem:[%s389_s17] ss:$0 sm:$0xff]  ;;  %s496_s25 = scalar_lea.vmem [#allocation2], %s495_s22  ;;  %s1451_s10 = sshll.u32 %s1597_s18, 1 }
  0x14   : > { %v492_v8 = vld [vmem:[#allocation3] sm:$0x3]  ;;  %1423 = vmatmul.msk.bf16.vlgmr.msra.gmra.mxu0 %vm435_vm1, %v1484_v4  ;;  %1432 = vmatmul.msk.bf16.vlgmr.msra.gmra.mxu1 %vm435_vm1, %v1482_v5  ;;  %s1279_s7 = scalar_lea.vmem [#allocation2], %s1439_s6  ;;  %s1298_s11 = scalar_lea.vmem [#allocation2], %s1451_s10 }
  0x15   : > { %691 = vmatpush.bf16.msrb.mxu0 %v1486_v3  ;;  %775 = vmatpush.bf16.msrb.mxu1 %v1486_v3  ;;  %567 = vst [vmem:[#allocation1] ss:$4 sm:$0xff] %v565_v7  ;;  %v498_v9 = vpack.c.bf16 %v492_v8, %v492_v8  ;;  %v493_v24 = vld [vmem:[#allocation4] sm:$0x3]  ;;  %s1466_s17 = smul.u32 4294967286, %s1597_s18  ;;  %s903_s10 = scalar_lea.vmem %s1679_s28, %s1746_s12 }
  0x16   : > { %859 = vmatpush.bf16.msrb.mxu2 %v1486_v3  ;;  %944 = vmatpush.bf16.msrb.mxu3 %v1486_v3  ;;  %s1312_s13 = smul.u32 4294967293, %s1597_s18 }
  0x17   : > { %1437 = vmatmul.msk.bf16.vlgmr.msra.gmra.mxu2 %vm435_vm1, %v498_v9  ;;  %s1320_s22 = scalar_lea.vmem [#allocation2], %s1466_s17  ;;  %s1322_s15 = smul.u32 4294967291, %s1597_s18 }
  0x18   : > { %s1332_s17 = smul.u32 4294967289, %s1597_s18 }
  0x19   : > { %1029 = vmatpush.bf16.msra.mxu0 %v1486_v3  ;;  %1114 = vmatpush.bf16.msra.mxu1 %v1486_v3 }
  0x91   : > { %v448_v11 = vpop.f32.mrf.mxu0  ;;  %v476_v12 = vpop.f32.mrf.mxu1 }
  0x92   : > { %v477_v13 = vadd.f32 %v476_v12, %v448_v11 }
  0x94   : > { %v485_v14 = vadd.f32 %v1518_v10, %v477_v13 }
  0x96   : > { %488 = vst.msk [vmem:[#allocation2] sm:$0xff] %vm487_vm2, %v485_v14 }
  0x99   : > { %v450_v15 = vpop.f32.mrf.mxu0  ;;  %v478_v16 = vpop.f32.mrf.mxu1 }
  0x9a   : > { %v479_v17 = vadd.f32 %v478_v16, %v450_v15  ;;  %v517_v18 = vpop.f32.mrf.mxu2 }
  0x9c   : > { %v486_v19 = vadd.f32 %v1518_v10, %v479_v17 }
  0x9e   : > { %489 = vst.msk [vmem:[#allocation2 + $0x8] sm:$0xff] %vm487_vm2, %v486_v19 }
  0xa2   : > { %v519_v20 = vpop.f32.mrf.mxu2 }
  0xa5   : > { %v497_v21 = vld [vmem:[%s496_s25] sm:$0x3]  ;;  %v1440_v49 = vld [vmem:[%s1279_s7 + $0x2] sm:$0x3]  ;;  %v1446_v13 = vld [vmem:[%s1289_s9 + $0x4] sm:$0x3]  ;;  %s1300_s9 = scalar_lea.vmem %s1679_s28, %s1597_s18 }
  0xa6   : > { %v521_v22 = vadd.f32 %v517_v18, %v497_v21  ;;  %s1281_s25 = smul.u32 5, %s1597_s18 }
  0xa7   : > { %s1291_s7 = smul.u32 3, %s1597_s18 }
  0xa8   : > { %1519 = vtanh.f32 %v521_v22  ;;  %v1438_v25 = vmul.f32 -1.442695, %v521_v22  ;;  %s1282_s6 = scalar_lea.vmem %s1679_s28, %s1281_s25 }
  0xa9   : > { %s1292_s8 = scalar_lea.vmem %s1679_s28, %s1291_s7 }
  0xaa   : > { %1521 = vpow2.f32 %v1438_v25 }
  0xae   : > { %v1520_v23 = vpop.eup %1519 }
  0xaf   : > { %548 = vrot.lane.b32.xlu0 %v1520_v23, %s1608_s26 }
  0xb0   : > { %v1522_v26 = vpop.eup %1521 }
  0xb1   : > { %v525_v27 = vadd.f32 1.0, %v1522_v26 }
  0xb3   : > { %1523 = vrcp.f32 %v525_v27  ;;  %v537_v33 = vand.u32 2147483648, %v525_v27  ;;  %vm531_vm4 = vweird.f32 %v525_v27  ;;  %v535_v34 = vand.u32 2147483647, %v525_v27 }
  0xb5   : > { %v538_v36 = vor.u32 1.1754944e-38, %v537_v33  ;;  %vm536_vm6 = vcmp.eq.f32.partialorder %v535_v34, 8.507059e+37 }
  0xb7   : > { %543 = vrot.lane.b32.xlu0 %v493_v24, %s1609_s27 }
  0xb9   : > { %v1524_v28 = vpop.eup %1523 }
  0xba   : > { %v527_v29 = vmul.f32 %v1524_v28, %v525_v27  ;;  %vm532_vm3 = vweird.f32 %v1524_v28 }
  0xbb   : > { %vm533_vm5 = vmor %vm531_vm4, %vm532_vm3 }
  0xbc   : > { %v528_v30 = vsub.f32 1.0, %v527_v29 }
  0xbe   : > { %v529_v31 = vmul.f32 %v1524_v28, %v528_v30 }
  0xc0   : > { %v530_v32 = vadd.f32 %v1524_v28, %v529_v31 }
  0xc2   : > { %v534_v35 = vsel %vm533_vm5, %v1524_v28, %v530_v32 }
  0xc3   : > { %v539_v38 = vsel %vm536_vm6, %v538_v36, %v534_v35 }
 0x121   : > { %v549_v37 = vpop.permute.xlu0 %548 }
 0x122   : > { %v551_v39 = vmul.f32 %v549_v37, %v539_v38 }
 0x124   : > { %553 = vrot.lane.b32.xlu1 %v551_v39, %s1609_s27 }
 0x129   : > { %v544_v40 = vpop.permute.xlu0 %543 }
 0x12a   : > { %v546_v41 = vmul.f32 %v544_v40, %v539_v38 }
 0x196   : > { %v554_v42 = vpop.permute.xlu1 %553 }
 0x197   : > { %v556_v43 = vadd.f32 %v554_v42, %v546_v41  ;;  %v1452_v41 = vld [vmem:[%s1298_s11 + $0x6] sm:$0x3]  ;;  %s1612_s11 = smov 48  }
 0x199   : > { %1525 = vtanh.f32 %v556_v43 }
 0x19f   : > { %v1526_v44 = vpop.eup %1525 }
 0x1a0   : > { %559 = vrot.lane.b32.xlu1 %v1526_v44, %s1610_s29 }
 0x212   : > { %v560_v45 = vpop.permute.xlu1 %559 }
 0x213   : > { %v1709_v46 = vmul.f32 %v560_v45, %v539_v38 }
 0x215   : > { %v592_v47 = vpack.c.bf16 %v1709_v46, %v1709_v46 }
 0x217   : > { %594 = vrot.lane.b32.xlu2 %v592_v47, %s1611_s30 }
 0x271   : > { %v595_v48 = vpop.permute.xlu2 %594 }
 0x272   : > { %1441 = vmatmul.msk.bf16.vlgmr.msra.gmra.mxu3 %vm435_vm1, %v595_v48 }
 0x2f5   : > { %v608_v50 = vpop.f32.mrf.mxu3 }
 0x2f6   : > { %v612_v51 = vadd.f32 %v1440_v49, %v608_v50 }
 0x2f8   : > { %1527 = vtanh.f32 %v612_v51  ;;  %v1442_v54 = vmul.f32 -1.442695, %v612_v51 }
 0x2fa   : > { %1529 = vpow2.f32 %v1442_v54 }
 0x2fd   : > { %v610_v52 = vpop.f32.mrf.mxu3 }
 0x2fe   : > { %v1528_v53 = vpop.eup %1527 }
 0x2ff   : > { %635 = vrot.lane.b32.xlu2 %v1528_v53, %s1608_s26 }
 0x300   : > { %v1530_v55 = vpop.eup %1529 }
 0x301   : > { %v616_v56 = vadd.f32 1.0, %v1530_v55 }
 0x303   : > { %1531 = vrcp.f32 %v616_v56  ;;  %v628_v62 = vand.u32 2147483648, %v616_v56  ;;  %vm622_vm8 = vweird.f32 %v616_v56  ;;  %v626_v63 = vand.u32 2147483647, %v616_v56 }
 0x305   : > { %v629_v1 = vor.u32 1.1754944e-38, %v628_v62  ;;  %vm627_vm10 = vcmp.eq.f32.partialorder %v626_v63, 8.507059e+37 }
 0x309   : > { %v1532_v57 = vpop.eup %1531 }
 0x30a   : > { %v618_v58 = vmul.f32 %v1532_v57, %v616_v56  ;;  %vm623_vm7 = vweird.f32 %v1532_v57 }
 0x30b   : > { %vm624_vm9 = vmor %vm622_vm8, %vm623_vm7 }
 0x30c   : > { %v619_v59 = vsub.f32 1.0, %v618_v58 }
 0x30e   : > { %v620_v60 = vmul.f32 %v1532_v57, %v619_v59 }
 0x310   : > { %v621_v61 = vadd.f32 %v1532_v57, %v620_v60 }
 0x312   : > { %v625_v0 = vsel %vm624_vm9, %v1532_v57, %v621_v61 }
 0x313   : > { %v630_v3 = vsel %vm627_vm10, %v629_v1, %v625_v0 }
 0x314   : > { %v633_v5 = vmul.f32 %v630_v3, %v556_v43 }
 0x359   : > { %v636_v2 = vpop.permute.xlu2 %635 }
 0x35a   : > { %v638_v4 = vmul.f32 %v636_v2, %v630_v3 }
 0x35c   : > { %640 = vrot.lane.b32.xlu0 %v638_v4, %s1609_s27 }
 0x3ce   : > { %v641_v6 = vpop.permute.xlu0 %640 }
 0x3cf   : > { %v643_v7 = vadd.f32 %v641_v6, %v633_v5  ;;  %v844_v6 = vld [vmem:[%s843_s14] sm:$0x3]  ;;  %s1313_s14 = scalar_lea.vmem %s1679_s28, %s1312_s13 }
 0x3d1   : > { %1533 = vtanh.f32 %v643_v7 }
 0x3d7   : > { %v1534_v8 = vpop.eup %1533 }
 0x3d8   : > { %646 = vrot.lane.b32.xlu1 %v1534_v8, %s1610_s29 }
 0x44a   : > { %v647_v9 = vpop.permute.xlu1 %646 }
 0x44b   : > { %v1719_v10 = vmul.f32 %v647_v9, %v630_v3 }
 0x44d   : > { %v677_v11 = vpack.c.bf16 %v1719_v10, %v1719_v10 }
 0x44f   : > { %679 = vrot.lane.b32.xlu2 %v677_v11, %s1611_s30 }
 0x4a9   : > { %v680_v12 = vpop.permute.xlu2 %679 }
 0x4aa   : > { %1447 = vmatmul.msk.bf16.vlgmr.msrb.gmra.mxu0 %vm435_vm1, %v680_v12 }
 0x527   : > { %v693_v14 = vpop.f32.mrf.mxu0 }
 0x528   : > { %v697_v15 = vadd.f32 %v1446_v13, %v693_v14 }
 0x52a   : > { %1535 = vtanh.f32 %v697_v15  ;;  %v1448_v18 = vmul.f32 -1.442695, %v697_v15 }
 0x52c   : > { %1537 = vpow2.f32 %v1448_v18 }
 0x52f   : > { %v695_v16 = vpop.f32.mrf.mxu0 }
 0x530   : > { %v1536_v17 = vpop.eup %1535 }
 0x531   : > { %720 = vrot.lane.b32.xlu0 %v1536_v17, %s1608_s26 }
 0x532   : > { %v1538_v19 = vpop.eup %1537 }
 0x533   : > { %v701_v20 = vadd.f32 1.0, %v1538_v19 }
 0x535   : > { %1539 = vrcp.f32 %v701_v20  ;;  %v713_v26 = vand.u32 2147483648, %v701_v20  ;;  %vm707_vm12 = vweird.f32 %v701_v20  ;;  %v711_v27 = vand.u32 2147483647, %v701_v20 }
 0x537   : > { %v714_v29 = vor.u32 1.1754944e-38, %v713_v26  ;;  %vm712_vm14 = vcmp.eq.f32.partialorder %v711_v27, 8.507059e+37 }
 0x53b   : > { %v1540_v21 = vpop.eup %1539 }
 0x53c   : > { %v703_v22 = vmul.f32 %v1540_v21, %v701_v20  ;;  %vm708_vm11 = vweird.f32 %v1540_v21 }
 0x53d   : > { %vm709_vm13 = vmor %vm707_vm12, %vm708_vm11 }
 0x53e   : > { %v704_v23 = vsub.f32 1.0, %v703_v22 }
 0x540   : > { %v705_v24 = vmul.f32 %v1540_v21, %v704_v23 }
 0x542   : > { %v706_v25 = vadd.f32 %v1540_v21, %v705_v24 }
 0x544   : > { %v710_v28 = vsel %vm709_vm13, %v1540_v21, %v706_v25 }
 0x545   : > { %v715_v31 = vsel %vm712_vm14, %v714_v29, %v710_v28 }
 0x546   : > { %v718_v33 = vmul.f32 %v715_v31, %v643_v7 }
 0x5a3   : > { %v721_v30 = vpop.permute.xlu0 %720 }
 0x5a4   : > { %v723_v32 = vmul.f32 %v721_v30, %v715_v31 }
 0x5a6   : > { %725 = vrot.lane.b32.xlu1 %v723_v32, %s1609_s27 }
 0x618   : > { %v726_v34 = vpop.permute.xlu1 %725 }
 0x619   : > { %v728_v35 = vadd.f32 %v726_v34, %v718_v33 }
 0x61b   : > { %1541 = vtanh.f32 %v728_v35 }
 0x621   : > { %v1542_v36 = vpop.eup %1541 }
 0x622   : > { %731 = vrot.lane.b32.xlu2 %v1542_v36, %s1610_s29 }
 0x67c   : > { %v732_v37 = vpop.permute.xlu2 %731 }
 0x67d   : > { %v1729_v38 = vmul.f32 %v732_v37, %v715_v31 }
 0x67f   : > { %v761_v39 = vpack.c.bf16 %v1729_v38, %v1729_v38 }
 0x681   : > { %763 = vrot.lane.b32.xlu0 %v761_v39, %s1611_s30 }
 0x6f3   : > { %v764_v40 = vpop.permute.xlu0 %763 }
 0x6f4   : > { %1453 = vmatmul.msk.bf16.vlgmr.msrb.gmra.mxu1 %vm435_vm1, %v764_v40 }
 0x771   : > { %v777_v42 = vpop.f32.mrf.mxu1 }
 0x772   : > { %v781_v43 = vadd.f32 %v1452_v41, %v777_v42 }
 0x774   : > { %1543 = vtanh.f32 %v781_v43  ;;  %v1454_v47 = vmul.f32 -1.442695, %v781_v43 }
 0x776   : > { %1545 = vpow2.f32 %v1454_v47 }
 0x779   : > { %v779_v44 = vpop.f32.mrf.mxu1 }
 0x77a   : > { %v1544_v45 = vpop.eup %1543 }
 0x77b   : > { %804 = vrot.lane.b32.xlu1 %v1544_v45, %s1608_s26 }
 0x77c   : > { %v1546_v48 = vpop.eup %1545 }
 0x77d   : > { %v785_v49 = vadd.f32 1.0, %v1546_v48 }
 0x77f   : > { %1547 = vrcp.f32 %v785_v49  ;;  %v797_v55 = vand.u32 2147483648, %v785_v49  ;;  %vm791_vm2 = vweird.f32 %v785_v49  ;;  %v795_v56 = vand.u32 2147483647, %v785_v49 }
 0x781   : > { %v798_v58 = vor.u32 1.1754944e-38, %v797_v55  ;;  %vm796_vm4 = vcmp.eq.f32.partialorder %v795_v56, 8.507059e+37 }
 0x785   : > { %v1548_v50 = vpop.eup %1547 }
 0x786   : > { %v787_v51 = vmul.f32 %v1548_v50, %v785_v49  ;;  %vm792_vm15 = vweird.f32 %v1548_v50 }
 0x787   : > { %vm793_vm3 = vmor %vm791_vm2, %vm792_vm15 }
 0x788   : > { %v788_v52 = vsub.f32 1.0, %v787_v51 }
 0x78a   : > { %v789_v53 = vmul.f32 %v1548_v50, %v788_v52 }
 0x78c   : > { %v790_v54 = vadd.f32 %v1548_v50, %v789_v53 }
 0x78e   : > { %v794_v57 = vsel %vm793_vm3, %v1548_v50, %v790_v54 }
 0x78f   : > { %v799_v60 = vsel %vm796_vm4, %v798_v58, %v794_v57 }
 0x790   : > { %v802_v62 = vmul.f32 %v799_v60, %v728_v35  ;;  %v1461_v35 = vld [vmem:[%s1310_s16 + $0xa] sm:$0x3]  ;;  %s1323_s16 = scalar_lea.vmem %s1679_s28, %s1322_s15 }
 0x7ed   : > { %v805_v59 = vpop.permute.xlu1 %804 }
 0x7ee   : > { %v807_v61 = vmul.f32 %v805_v59, %v799_v60 }
 0x7f0   : > { %809 = vrot.lane.b32.xlu2 %v807_v61, %s1609_s27 }
 0x84a   : > { %v810_v63 = vpop.permute.xlu2 %809 }
 0x84b   : > { %v812_v0 = vadd.f32 %v810_v63, %v802_v62 }
 0x84d   : > { %1549 = vtanh.f32 %v812_v0 }
 0x853   : > { %v1550_v1 = vpop.eup %1549 }
 0x854   : > { %815 = vrot.lane.b32.xlu0 %v1550_v1, %s1610_s29  ;;  %v1467_v1 = vld [vmem:[%s1320_s22 + $0xc] sm:$0x3]  ;;  %s1333_s22 = scalar_lea.vmem %s1679_s28, %s1332_s17  ;;  %s1613_s28 = smov 112  }
 0x8c6   : > { %v816_v2 = vpop.permute.xlu0 %815 }
 0x8c7   : > { %v1739_v3 = vmul.f32 %v816_v2, %v799_v60 }
 0x8c9   : > { %v845_v4 = vpack.c.bf16 %v1739_v3, %v1739_v3 }
 0x8cb   : > { %847 = vrot.lane.b32.xlu1 %v845_v4, %s1611_s30 }
 0x93d   : > { %v848_v5 = vpop.permute.xlu1 %847 }
 0x93e   : > { %1458 = vmatmul.msk.bf16.vlgmr.msrb.gmra.mxu2 %vm435_vm1, %v848_v5 }
 0x9c1   : > { %v861_v7 = vpop.f32.mrf.mxu2 }
 0x9c2   : > { %v865_v8 = vadd.f32 %v861_v7, %v844_v6 }
 0x9c4   : > { %1551 = vtanh.f32 %v865_v8  ;;  %v1459_v12 = vmul.f32 -1.442695, %v865_v8 }
 0x9c6   : > { %1553 = vpow2.f32 %v1459_v12 }
 0x9c9   : > { %v863_v9 = vpop.f32.mrf.mxu2 }
 0x9ca   : > { %v1552_v11 = vpop.eup %1551 }
 0x9cb   : > { %888 = vrot.lane.b32.xlu2 %v1552_v11, %s1608_s26 }
 0x9cc   : > { %v1554_v13 = vpop.eup %1553 }
 0x9cd   : > { %v869_v14 = vadd.f32 1.0, %v1554_v13 }
 0x9cf   : > { %1555 = vrcp.f32 %v869_v14  ;;  %v881_v20 = vand.u32 2147483648, %v869_v14  ;;  %vm875_vm6 = vweird.f32 %v869_v14  ;;  %v879_v21 = vand.u32 2147483647, %v869_v14 }
 0x9d1   : > { %v882_v23 = vor.u32 1.1754944e-38, %v881_v20  ;;  %vm880_vm8 = vcmp.eq.f32.partialorder %v879_v21, 8.507059e+37 }
 0x9d5   : > { %v1556_v15 = vpop.eup %1555 }
 0x9d6   : > { %v871_v16 = vmul.f32 %v1556_v15, %v869_v14  ;;  %vm876_vm5 = vweird.f32 %v1556_v15 }
 0x9d7   : > { %vm877_vm7 = vmor %vm875_vm6, %vm876_vm5  ;;  %vm576_vm6 = vcmask 1040384  }
 0x9d8   : > { %v872_v17 = vsub.f32 1.0, %v871_v16 }
 0x9da   : > { %v873_v18 = vmul.f32 %v1556_v15, %v872_v17 }
 0x9dc   : > { %v874_v19 = vadd.f32 %v1556_v15, %v873_v18 }
 0x9de   : > { %v878_v22 = vsel %vm877_vm7, %v1556_v15, %v874_v19  ;;  %vm585_vm7 = vcmask 122880  }
 0x9df   : > { %v883_v25 = vsel %vm880_vm8, %v882_v23, %v878_v22 }
 0x9e0   : > { %v886_v27 = vmul.f32 %v883_v25, %v812_v0 }
 0xa25   : > { %v889_v24 = vpop.permute.xlu2 %888 }
 0xa26   : > { %v891_v26 = vmul.f32 %v889_v24, %v883_v25 }
 0xa28   : > { %893 = vrot.lane.b32.xlu0 %v891_v26, %s1609_s27 }
 0xa9a   : > { %v894_v28 = vpop.permute.xlu0 %893 }
 0xa9b   : > { %v896_v29 = vadd.f32 %v894_v28, %v886_v27  ;;  %v1443_v27 = vld [vmem:[%s1282_s6 + $0x1] sm:$0x1]  ;;  %s1472_s6 = smul.u32 4294967282, %s1597_s18 }
 0xa9c   : > { %v652_v28 = vunpack.c.l.bf16 %v1443_v27 }
 0xa9d   : > { %1557 = vtanh.f32 %v896_v29 }
 0xaa3   : > { %v1558_v30 = vpop.eup %1557 }
 0xaa4   : > { %899 = vrot.lane.b32.xlu1 %v1558_v30, %s1610_s29  ;;  %v1449_v30 = vld [vmem:[%s1292_s8 + $0x2] sm:$0x1]  ;;  %s1330_s8 = scalar_lea.vmem [#allocation2], %s1472_s6 }
 0xb16   : > { %v900_v31 = vpop.permute.xlu1 %899 }
 0xb17   : > { %v1752_v32 = vmul.f32 %v900_v31, %v883_v25  ;;  %v737_v31 = vunpack.c.l.bf16 %v1449_v30 }
 0xb19   : > { %v930_v33 = vpack.c.bf16 %v1752_v32, %v1752_v32 }
 0xb1b   : > { %932 = vrot.lane.b32.xlu2 %v930_v33, %s1611_s30 }
 0xb75   : > { %v933_v34 = vpop.permute.xlu2 %932 }
 0xb76   : > { %1462 = vmatmul.msk.bf16.vlgmr.msrb.gmra.mxu3 %vm435_vm1, %v933_v34  ;;  %v1455_v34 = vld [vmem:[%s1300_s9 + $0x3] sm:$0x1] }
 0xbf9   : > { %v946_v36 = vpop.f32.mrf.mxu3 }
 0xbfa   : > { %v950_v37 = vadd.f32 %v1461_v35, %v946_v36  ;;  %v821_v35 = vunpack.c.l.bf16 %v1455_v34 }
 0xbfc   : > { %1559 = vtanh.f32 %v950_v37  ;;  %v1463_v41 = vmul.f32 -1.442695, %v950_v37  ;;  %v904_v37 = vld [vmem:[%s903_s10] sm:$0x1] }
 0xbfe   : > { %1561 = vpow2.f32 %v1463_v41 }
 0xc01   : > { %v948_v39 = vpop.f32.mrf.mxu3 }
 0xc02   : > { %v1560_v40 = vpop.eup %1559  ;;  %v905_v39 = vunpack.c.l.bf16 %v904_v37 }
 0xc03   : > { %973 = vrot.lane.b32.xlu0 %v1560_v40, %s1608_s26 }
 0xc04   : > { %v1562_v42 = vpop.eup %1561 }
 0xc05   : > { %v954_v43 = vadd.f32 1.0, %v1562_v42 }
 0xc07   : > { %1563 = vrcp.f32 %v954_v43  ;;  %v966_v50 = vand.u32 2147483648, %v954_v43  ;;  %vm960_vm10 = vweird.f32 %v954_v43  ;;  %v964_v51 = vand.u32 2147483647, %v954_v43 }
 0xc09   : > { %v967_v53 = vor.u32 1.1754944e-38, %v966_v50  ;;  %vm965_vm12 = vcmp.eq.f32.partialorder %v964_v51, 8.507059e+37 }
 0xc0d   : > { %v1564_v44 = vpop.eup %1563 }
 0xc0e   : > { %v956_v45 = vmul.f32 %v1564_v44, %v954_v43  ;;  %vm961_vm9 = vweird.f32 %v1564_v44 }
 0xc0f   : > { %vm962_vm11 = vmor %vm960_vm10, %vm961_vm9 }
 0xc10   : > { %v957_v47 = vsub.f32 1.0, %v956_v45  ;;  %v1464_v45 = vld [vmem:[%s1313_s14 + $0x5] sm:$0x1] }
 0xc12   : > { %v958_v48 = vmul.f32 %v1564_v44, %v957_v47  ;;  %v990_v47 = vunpack.c.l.bf16 %v1464_v45 }
 0xc14   : > { %v959_v49 = vadd.f32 %v1564_v44, %v958_v48 }
 0xc16   : > { %v963_v52 = vsel %vm962_vm11, %v1564_v44, %v959_v49  ;;  %v1470_v49 = vld [vmem:[%s1323_s16 + $0x6] sm:$0x1] }
 0xc17   : > { %v968_v55 = vsel %vm965_vm12, %v967_v53, %v963_v52  ;;  %v1075_v50 = vunpack.c.l.bf16 %v1470_v49  ;;  %v1476_v52 = vld [vmem:[%s1333_s22 + $0x7] sm:$0x1] }
 0xc18   : > { %v971_v57 = vmul.f32 %v968_v55, %v896_v29  ;;  %v568_v29 = vld.sshfl [vmem:[#allocation1] sm:$0xff pattern:$0x73625140]  ;;  %v1160_v53 = vunpack.c.l.bf16 %v1476_v52 }
 0xc19   : > { %654 = vst [vmem:[#allocation1] ss:$4 sm:$0xff] %v652_v28 }
 0xc20   : > { %v655_v33 = vld.sshfl [vmem:[#allocation1] sm:$0xff pattern:$0x73625140] }
 0xc21   : > { %739 = vst [vmem:[#allocation1] ss:$4 sm:$0xff] %v737_v31 }
 0xc28   : > { %v1787_v36 = vld.sshfl [vmem:[#allocation1] sm:$0xff pattern:$0x73625140] }
 0xc29   : > { %823 = vst [vmem:[#allocation1] ss:$4 sm:$0xff] %v821_v35 }
 0xc30   : > { %v824_v40 = vld.sshfl [vmem:[#allocation1] sm:$0xff pattern:$0x73625140] }
 0xc31   : > { %907 = vst [vmem:[#allocation1] ss:$4 sm:$0xff] %v905_v39 }
 0xc38   : > { %v908_v48 = vld.sshfl [vmem:[#allocation1] sm:$0xff pattern:$0x73625140] }
 0xc39   : > { %992 = vst [vmem:[#allocation1] ss:$4 sm:$0xff] %v990_v47 }
 0xc40   : > { %v993_v51 = vld.sshfl [vmem:[#allocation1] sm:$0xff pattern:$0x73625140] }
 0xc41   : > { %1077 = vst [vmem:[#allocation1] ss:$4 sm:$0xff] %v1075_v50 }
 0xc75   : > { %v974_v54 = vpop.permute.xlu0 %973 }
 0xc76   : > { %v976_v56 = vmul.f32 %v974_v54, %v968_v55  ;;  %v1473_v54 = vld [vmem:[%s1330_s8 + $0xe] sm:$0x3] }
 0xc78   : > { %978 = vrot.lane.b32.xlu1 %v976_v56, %s1609_s27 }
 0xcea   : > { %v979_v58 = vpop.permute.xlu1 %978 }
 0xceb   : > { %v981_v59 = vadd.f32 %v979_v58, %v971_v57  ;;  %v1078_v57 = vld.sshfl [vmem:[#allocation1] sm:$0xff pattern:$0x73625140] }
 0xcec   : > { %1162 = vst [vmem:[#allocation1] ss:$4 sm:$0xff] %v1160_v53 }
 0xced   : > { %1565 = vtanh.f32 %v981_v59 }
 0xcf3   : > { %v1566_v60 = vpop.eup %1565 }
 0xcf4   : > { %984 = vrot.lane.b32.xlu2 %v1566_v60, %s1610_s29 }
 0xd4e   : > { %v985_v61 = vpop.permute.xlu2 %984 }
 0xd4f   : > { %v1762_v62 = vmul.f32 %v985_v61, %v968_v55 }
 0xd51   : > { %v1015_v63 = vpack.c.bf16 %v1762_v62, %v1762_v62 }
 0xd53   : > { %1017 = vrot.lane.b32.xlu0 %v1015_v63, %s1611_s30 }
 0xdc5   : > { %v1018_v0 = vpop.permute.xlu0 %1017 }
 0xdc6   : > { %1468 = vmatmul.msk.bf16.vlgmr.msra.gmra.mxu0 %vm435_vm1, %v1018_v0 }
 0xe43   : > { %v1031_v2 = vpop.f32.mrf.mxu0 }
 0xe44   : > { %v1035_v4 = vadd.f32 %v1467_v1, %v1031_v2 }
 0xe46   : > { %1567 = vtanh.f32 %v1035_v4  ;;  %v1469_v7 = vmul.f32 -1.442695, %v1035_v4 }
 0xe48   : > { %1569 = vpow2.f32 %v1469_v7 }
 0xe4b   : > { %v1033_v5 = vpop.f32.mrf.mxu0 }
 0xe4c   : > { %v1568_v6 = vpop.eup %1567 }
 0xe4d   : > { %1058 = vrot.lane.b32.xlu1 %v1568_v6, %s1608_s26 }
 0xe4e   : > { %v1570_v8 = vpop.eup %1569 }
 0xe4f   : > { %v1039_v9 = vadd.f32 1.0, %v1570_v8 }
 0xe51   : > { %1571 = vrcp.f32 %v1039_v9  ;;  %v1051_v16 = vand.u32 2147483648, %v1039_v9  ;;  %vm1045_vm14 = vweird.f32 %v1039_v9  ;;  %v1049_v17 = vand.u32 2147483647, %v1039_v9 }
 0xe53   : > { %v1052_v19 = vor.u32 1.1754944e-38, %v1051_v16  ;;  %vm1050_vm2 = vcmp.eq.f32.partialorder %v1049_v17, 8.507059e+37 }
 0xe57   : > { %v1572_v11 = vpop.eup %1571 }
 0xe58   : > { %v1041_v12 = vmul.f32 %v1572_v11, %v1039_v9  ;;  %vm1046_vm13 = vweird.f32 %v1572_v11 }
 0xe59   : > { %vm1047_vm15 = vmor %vm1045_vm14, %vm1046_vm13 }
 0xe5a   : > { %v1042_v13 = vsub.f32 1.0, %v1041_v12 }
 0xe5c   : > { %v1043_v14 = vmul.f32 %v1572_v11, %v1042_v13 }
 0xe5e   : > { %v1044_v15 = vadd.f32 %v1572_v11, %v1043_v14 }
 0xe60   : > { %v1048_v18 = vsel %vm1047_vm15, %v1572_v11, %v1044_v15 }
 0xe61   : > { %v1053_v21 = vsel %vm1050_vm2, %v1052_v19, %v1048_v18 }
 0xe62   : > { %v1056_v23 = vmul.f32 %v1053_v21, %v981_v59 }
 0xebf   : > { %v1059_v20 = vpop.permute.xlu1 %1058 }
 0xec0   : > { %v1061_v22 = vmul.f32 %v1059_v20, %v1053_v21 }
 0xec2   : > { %1063 = vrot.lane.b32.xlu2 %v1061_v22, %s1609_s27 }
 0xf1c   : > { %v1064_v24 = vpop.permute.xlu2 %1063 }
 0xf1d   : > { %v1771_v25 = vadd.f32 %v1064_v24, %v1056_v23 }
 0xf1f   : > { %1573 = vtanh.f32 %v1771_v25 }
 0xf25   : > { %v1574_v26 = vpop.eup %1573 }
 0xf26   : > { %1069 = vrot.lane.b32.xlu0 %v1574_v26, %s1610_s29 }
 0xf98   : > { %v1070_v41 = vpop.permute.xlu0 %1069 }
 0xf99   : > { %v1789_v42 = vmul.f32 %v1070_v41, %v1053_v21 }
 0xf9b   : > { %v1100_v43 = vpack.c.bf16 %v1789_v42, %v1789_v42 }
 0xf9d   : > { %1102 = vrot.lane.b32.xlu1 %v1100_v43, %s1611_s30 }
 0xfa5   : > { %569 = vrot.lane.b32.xlu1 %v568_v29, %s1612_s11 }
 0xfad   : > { %825 = vrot.lane.b32.xlu1 %v824_v40, %s1612_s11 }
0x100f   : > { %v1103_v44 = vpop.permute.xlu1 %1102 }
0x1010   : > { %1474 = vmatmul.msk.bf16.vlgmr.msra.gmra.mxu1 %vm435_vm1, %v1103_v44 }
0x1017   : > { %v570_v26 = vpop.permute.xlu1 %569 }
0x1018   : > { %v572_v29 = vadd.f32 %v570_v26, %v1709_v46 }
0x101a   : > { %v573_v31 = vpack.c.bf16 %v572_v29, %v572_v29 }
0x101f   : > { %v826_v34 = vpop.permute.xlu1 %825 }
0x1020   : > { %v828_v37 = vadd.f32 %v826_v34, %v1739_v3 }
0x1022   : > { %v829_v41 = vpack.c.bf16 %v828_v37, %v828_v37 }
0x1024   : > { %v831_v45 = vrot.slane %v829_v41, 3 }
0x1026   : > { %v834_v50 = vsel %vm576_vm6, %v829_v41, %v831_v45 }
0x108d   : > { %v1116_v55 = vpop.f32.mrf.mxu1 }
0x108e   : > { %v1120_v56 = vadd.f32 %v1473_v54, %v1116_v55 }
0x1090   : > { %1575 = vtanh.f32 %v1120_v56  ;;  %v1475_v60 = vmul.f32 -1.442695, %v1120_v56 }
0x1092   : > { %1577 = vpow2.f32 %v1475_v60 }
0x1095   : > { %v1118_v58 = vpop.f32.mrf.mxu1 }
0x1096   : > { %v1576_v59 = vpop.eup %1575 }
0x1097   : > { %1143 = vrot.lane.b32.xlu2 %v1576_v59, %s1608_s26 }
0x1098   : > { %v1578_v61 = vpop.eup %1577 }
0x1099   : > { %v1124_v63 = vadd.f32 1.0, %v1578_v61 }
0x109b   : > { %1579 = vrcp.f32 %v1124_v63  ;;  %v1136_v6 = vand.u32 2147483648, %v1124_v63  ;;  %vm1130_vm3 = vweird.f32 %v1124_v63  ;;  %v1134_v7 = vand.u32 2147483647, %v1124_v63 }
0x109d   : > { %v1137_v9 = vor.u32 1.1754944e-38, %v1136_v6  ;;  %vm1135_vm5 = vcmp.eq.f32.partialorder %v1134_v7, 8.507059e+37 }
0x109f   : > { %656 = vrot.lane.b32.xlu2 %v655_v33, %s1612_s11 }
0x10a1   : > { %v1580_v0 = vpop.eup %1579 }
0x10a2   : > { %v1126_v1 = vmul.f32 %v1580_v0, %v1124_v63  ;;  %vm1131_vm1 = vweird.f32 %v1580_v0 }
0x10a3   : > { %vm1132_vm4 = vmor %vm1130_vm3, %vm1131_vm1 }
0x10a4   : > { %v1127_v2 = vsub.f32 1.0, %v1126_v1 }
0x10a6   : > { %v1128_v4 = vmul.f32 %v1580_v0, %v1127_v2 }
0x10a7   : > { %909 = vrot.lane.b32.xlu2 %v908_v48, %s1612_s11 }
0x10a8   : > { %v1129_v5 = vadd.f32 %v1580_v0, %v1128_v4 }
0x10aa   : > { %v1133_v8 = vsel %vm1132_vm4, %v1580_v0, %v1129_v5 }
0x10ab   : > { %v1138_v12 = vsel %vm1135_vm5, %v1137_v9, %v1133_v8 }
0x10ac   : > { %v1141_v24 = vmul.f32 %v1138_v12, %v1771_v25 }
0x10af   : > { %1079 = vrot.lane.b32.xlu2 %v1078_v57, %s1612_s11 }
0x10f1   : > { %v1144_v11 = vpop.permute.xlu2 %1143 }
0x10f2   : > { %v1146_v13 = vmul.f32 %v1144_v11, %v1138_v12 }
0x10f4   : > { %1148 = vrot.lane.b32.xlu0 %v1146_v13, %s1609_s27 }
0x10f9   : > { %v657_v14 = vpop.permute.xlu2 %656 }
0x10fa   : > { %v659_v15 = vadd.f32 %v657_v14, %v1719_v10  ;;  %v1163_v10 = vld.sshfl [vmem:[#allocation1] sm:$0xff pattern:$0x73625140] }
0x10fc   : > { %v660_v16 = vpack.c.bf16 %v659_v15, %v659_v15  ;;  %741 = vrot.lane.b32.xlu0 %v1787_v36, %s1612_s11  ;;  %v575_v36 = vrot.slane %v573_v31, 3 }
0x10fe   : > { %v662_v17 = vrot.slane %v660_v16, 3  ;;  %v579_v43 = vsel %vm576_vm6, %v573_v31, %v575_v36 }
0x1100   : > { %v665_v18 = vsel %vm576_vm6, %v660_v16, %v662_v17 }
0x1101   : > { %v910_v19 = vpop.permute.xlu2 %909  ;;  %667 = vrot.lane.b32.xlu2 %v665_v18, %s1611_s30 }
0x1102   : > { %v912_v20 = vadd.f32 %v910_v19, %v1752_v32 }
0x1104   : > { %v913_v21 = vpack.c.bf16 %v912_v20, %v912_v20  ;;  %994 = vrot.lane.b32.xlu0 %v993_v51, %s1612_s11 }
0x1106   : > { %v915_v22 = vrot.slane %v913_v21, 3 }
0x1108   : > { %v918_v23 = vsel %vm576_vm6, %v913_v21, %v915_v22 }
0x1109   : > { %920 = vrot.lane.b32.xlu2 %v918_v23, %s1611_s30  ;;  %v1080_v44 = vpop.permute.xlu2 %1079 }
0x110a   : > { %v1082_v47 = vadd.f32 %v1080_v44, %v1789_v42 }
0x110c   : > { %1164 = vrot.lane.b32.xlu0 %v1163_v10, %s1612_s11  ;;  %v1083_v49 = vpack.c.bf16 %v1082_v47, %v1082_v47 }
0x115b   : > { %v668_v56 = vpop.permute.xlu2 %667 }
0x1163   : > { %v921_v63 = vpop.permute.xlu2 %920 }
0x1166   : > { %v1149_v27 = vpop.permute.xlu0 %1148 }
0x1167   : > { %v1151_v28 = vadd.f32 %v1149_v27, %v1141_v24 }
0x1169   : > { %1581 = vtanh.f32 %v1151_v28 }
0x116e   : > { %v742_v32 = vpop.permute.xlu0 %741 }
0x116f   : > { %v1582_v30 = vpop.eup %1581  ;;  %v744_v33 = vadd.f32 %v742_v32, %v1729_v38 }
0x1170   : > { %1154 = vrot.lane.b32.xlu1 %v1582_v30, %s1610_s29  ;;  %s1846_s29 = scalar_lea.vmem %s1897_s5, %s1672_s24 }
0x1171   : > { %v745_v35 = vpack.c.bf16 %v744_v33, %v744_v33  ;;  %s584_s9 = scalar_lea.vmem %s1846_s29, %s494_s23  ;;  %s1285_s24 = scalar_lea.vmem %s1846_s29, %s1281_s25 }
0x1172   : > { %s1295_s10 = scalar_lea.vmem %s1846_s29, %s1291_s7  ;;  %s1302_s23 = scalar_lea.vmem %s1846_s29, %s1597_s18 }
0x1173   : > { %v747_v39 = vrot.slane %v745_v35, 3  ;;  %s923_s25 = scalar_lea.vmem %s1846_s29, %s1746_s12  ;;  %s1316_s11 = scalar_lea.vmem %s1846_s29, %s1312_s13 }
0x1174   : > { %s1326_s7 = scalar_lea.vmem %s1846_s29, %s1322_s15 }
0x1175   : > { %v750_v25 = vsel %vm576_vm6, %v745_v35, %v747_v39 }
0x1176   : > { %v995_v40 = vpop.permute.xlu0 %994  ;;  %752 = vrot.lane.b32.xlu0 %v750_v25, %s1611_s30 }
0x1177   : > { %v997_v46 = vadd.f32 %v995_v40, %v1762_v62  ;;  %v1085_v62 = vrot.slane %v1083_v49, 3 }
0x1178   : > { %581 = vrot.lane.b32.xlu1 %v579_v43, %s1611_s30 }
0x1179   : > { %v998_v38 = vpack.c.bf16 %v997_v46, %v997_v46  ;;  %v1088_v51 = vsel %vm576_vm6, %v1083_v49, %v1085_v62 }
0x117b   : > { %v1000_v3 = vrot.slane %v998_v38, 3 }
0x117d   : > { %v1003_v48 = vsel %vm576_vm6, %v998_v38, %v1000_v3 }
0x117e   : > { %1005 = vrot.lane.b32.xlu0 %v1003_v48, %s1611_s30  ;;  %v1165_v42 = vpop.permute.xlu0 %1164 }
0x1180   : > { %836 = vrot.lane.b32.xlu1 %v834_v50, %s1611_s30 }
0x1188   : > { %1090 = vrot.lane.b32.xlu1 %v1088_v51, %s1611_s30 }
0x1190   : > { %1187 = vrot.lane.b32.xlu1 %v1151_v28, %s1613_s28 }
0x11e2   : > { %v1155_v52 = vpop.permute.xlu1 %1154 }
0x11e3   : > { %v1157_v53 = vmul.f32 %v1155_v52, %v1138_v12 }
0x11e5   : > { %v1167_v54 = vadd.f32 %v1165_v42, %v1157_v53  ;;  %1181 = vrot.lane.b32.xlu0 %v1157_v53, %s1611_s30 }
0x11e7   : > { %v1168_v55 = vpack.c.bf16 %v1167_v54, %v1167_v54 }
0x11e8   : > { %v753_v58 = vpop.permute.xlu0 %752 }
0x11e9   : > { %v1170_v57 = vrot.slane %v1168_v55, 3 }
0x11ea   : > { %v582_v59 = vpop.permute.xlu1 %581 }
0x11eb   : > { %586 = vst.msk [vmem:[%s584_s9] sm:$0x1] %vm585_vm7, %v582_v59  ;;  %v1173_v60 = vsel %vm576_vm6, %v1168_v55, %v1170_v57 }
0x11ec   : > { %1444 = vst.msk [vmem:[%s1285_s24 + $0x1] sm:$0x1] %vm585_vm7, %v668_v56  ;;  %1175 = vrot.lane.b32.xlu2 %v1173_v60, %s1611_s30  ;;  %s1336_s30 = scalar_lea.vmem %s1846_s29, %s1332_s17 }
0x11ed   : > { %1450 = vst.msk [vmem:[%s1295_s10 + $0x2] sm:$0x1] %vm585_vm7, %v753_v58 }
0x11f0   : > { %v1006_v0 = vpop.permute.xlu0 %1005 }
0x11f2   : > { %v837_v61 = vpop.permute.xlu1 %836 }
0x11f3   : > { %1456 = vst.msk [vmem:[%s1302_s23 + $0x3] sm:$0x1] %vm585_vm7, %v837_v61 }
0x11f4   : > { %924 = vst.msk [vmem:[%s923_s25] sm:$0x1] %vm585_vm7, %v921_v63 }
0x11f5   : > { %1465 = vst.msk [vmem:[%s1316_s11 + $0x5] sm:$0x1] %vm585_vm7, %v1006_v0 }
0x11fa   : > { %v1091_v1 = vpop.permute.xlu1 %1090 }
0x11fb   : > { %1471 = vst.msk [vmem:[%s1326_s7 + $0x6] sm:$0x1] %vm585_vm7, %v1091_v1 }
0x1202   : > { %v1188_v2 = vpop.permute.xlu1 %1187 }
0x1203   : > { %1190 = vst.msk [vmem:[#allocation4] sm:$0x3] %vm411_vm0, %v1188_v2 }
0x1246   : > { %v1176_v4 = vpop.permute.xlu2 %1175 }
0x1247   : > { %1477 = vst.msk [vmem:[%s1336_s30 + $0x7] sm:$0x1] %vm585_vm7, %v1176_v4 }
0x1257   : > { %v1182_v5 = vpop.permute.xlu0 %1181 }
0x1258   : > { %1185 = vst.msk [vmem:[#allocation3] sm:$0x3] %vm411_vm0, %v1182_v5 }
0x1259 PF: > { %s15_s20 = sadd.s32 1, %s1605_s20   ;;  %s1898_s18 = smov %s1601_s19 }
0x125a   : > { %p12_p5 = scmp.ge.s32.totalorder %s15_s20, 4   ;;  %s1899_s19 = smov %s1901_s21 }
0x125c   :  { %14 = sbr.rel (!%p12_p5) target bundleno = 2 (0x2), region = 112 }

</bundles_post_ra>
